<compile_context>
chip_gen: v5e
topology: v5e:2x2
jax: 0.10.0
libtpu: 0.0.40
codegen_flags: <defaults>
</compile_context>

<pallas_src>
import functools

import jax
import jax.numpy as jnp
from jax import lax
from jax.experimental import pallas as pl
from jax.experimental.pallas import tpu as pltpu


def _round_up(x, m):
    return ((x + m - 1) // m) * m


def _pick_tile(n_pad, cap):
    t = cap
    while t > 128 and n_pad % t:
        t //= 2
    return t


def _soft_contrastive_kernel(
    x_ref,                                   # (n_pad, c_pad) resident features
    adj_ref,                                 # (TM, TN) streamed adjacency tile
    colsum_ref,                              # (1, c_pad) f32 column sum of X
    unsup_ref, sup_ref,                      # (TM, 128) per-row partial outputs
    m_ref, l_ref, wsum_ref, wssum_ref,       # (TM, 1) f32 scratch accumulators
    *, n_valid, n_pad, inv_temp, tm, tn,
):
    i = pl.program_id(0)
    j = pl.program_id(1)

    @pl.when(j == 0)
    def _init():
        m_ref[...] = jnp.full_like(m_ref, -jnp.inf)
        l_ref[...] = jnp.zeros_like(l_ref)
        wsum_ref[...] = jnp.zeros_like(wsum_ref)
        wssum_ref[...] = jnp.zeros_like(wssum_ref)

    row0 = pl.multiple_of(i * tm, tm)
    col0 = pl.multiple_of(j * tn, tn)
    x_row = x_ref[pl.ds(row0, tm), :]
    x_col = x_ref[pl.ds(col0, tn), :]

    # (TM, TN) similarity tile on the MXU: contract the last dims of both
    # operands (native rhs-transposed feed, no relayout); f32 accumulation.
    sim = lax.dot_general(
        x_row, x_col,
        dimension_numbers=(((1,), (1,)), ((), ())),
        preferred_element_type=jnp.float32,
    ) * inv_temp

    adj = adj_ref[...].astype(jnp.float32)

    def _accumulate(sim_for_max, sim_for_exp, wm):
        tile_max = jnp.max(sim_for_max, axis=1, keepdims=True)
        m_prev = m_ref[...]
        m_new = jnp.maximum(m_prev, tile_max)
        # Guard: never form exp(-inf - (-inf)); robust to tile order / padding.
        scale = jnp.where(m_prev == -jnp.inf, 0.0, jnp.exp(m_prev - m_new))
        exp_term = jnp.exp(sim_for_exp - m_new)
        l_ref[...] = scale * l_ref[...] + jnp.sum(exp_term, axis=1, keepdims=True)
        m_ref[...] = m_new
        wsum_ref[...] += jnp.sum(wm, axis=1, keepdims=True)
        wssum_ref[...] += jnp.sum(wm * sim, axis=1, keepdims=True)

    # Edge-tile predicate: tile straddles the diagonal and/or padded columns.
    diag_in_tile = jnp.logical_and(i * tm < (j + 1) * tn, j * tn < (i + 1) * tm)
    if n_pad != n_valid:
        needs_mask = jnp.logical_or(diag_in_tile, (j + 1) * tn > n_valid)
    else:
        needs_mask = diag_in_tile

    @pl.when(needs_mask)
    def _edge_tile():
        row_ids = row0 + lax.broadcasted_iota(jnp.int32, (tm, tn), 0)
        col_ids = col0 + lax.broadcasted_iota(jnp.int32, (tm, tn), 1)
        col_valid = col_ids < n_valid           # drop padded columns
        off_diag = row_ids != col_ids           # diag excluded from denom / wm
        _accumulate(
            jnp.where(col_valid, sim, -jnp.inf),
            jnp.where(col_valid & off_diag, sim, -jnp.inf),
            jnp.where((adj > 0) & off_diag, adj, 0.0),
        )

    @pl.when(jnp.logical_not(needs_mask))
    def _interior_tile():
        # No diagonal, no padding in this tile: skip the whole masking chain.
        _accumulate(sim, sim, jnp.where(adj > 0, adj, 0.0))

    @pl.when(j == pl.num_programs(1) - 1)
    def _finalize():
        logden = m_ref[...] + jnp.log(l_ref[...])                     # (TM, 1)
        row_valid = (row0 + lax.broadcasted_iota(jnp.int32, (tm, 1), 0)) < n_valid

        # sum_j sim[r, j] over the n_valid real columns (diag included):
        #   = inv_temp * x_row . colsum   (one tiny matvec per row block)
        ssim = inv_temp * jnp.sum(
            x_row.astype(jnp.float32) * colsum_ref[...], axis=1, keepdims=True)

        # sum_j log_prob[r, j] = sum_j sim - N*(max + log denom)
        unsup_row = jnp.where(row_valid, ssim - n_valid * logden, 0.0)

        # mean_log_prob_pos[r] = (sum wm*sim - sum wm*(max+log denom)) / guard
        mpp = jnp.where(wsum_ref[...] < 1e-6, 1.0, wsum_ref[...])
        mlpp = (wssum_ref[...] - wsum_ref[...] * logden) / mpp
        sup_row = jnp.where(row_valid, mlpp, 0.0)

        # lane-dense (TM, 128) stores; wrapper reads lane 0 of each row.
        unsup_ref[...] = jnp.broadcast_to(unsup_row, unsup_ref.shape)
        sup_ref[...] = jnp.broadcast_to(sup_row, sup_ref.shape)


def soft_contrastive_loss(features, adj, temperature=0.07, alpha=0.5):
    """features: (batch, n_views, C); adj: (batch*n_views, batch*n_views)."""
    batch, n_views, c = features.shape
    n = batch * n_views
    x = features.reshape(n, c)                       # == torch .view(-1, C)

    # (8,128)-aligned padding; padded columns are masked in-kernel, padded rows
    # are zeroed in-kernel.  Tile caps sized for v7x's 64 MiB/TC VMEM; smaller
    # N falls back to 128-aligned divisors.
    n_pad = _round_up(n, 128)
    c_pad = _round_up(c, 128)
    tm = _pick_tile(n_pad, 512)
    tn = _pick_tile(n_pad, 1024)

    # Keep the caller's dtype (pass bf16 to halve adj/x HBM traffic and hit the
    # bf16 MXU path); all softmax stats / matmul accumulation stay in f32.
    x_pad = jnp.zeros((n_pad, c_pad), dtype=x.dtype).at[:n, :c].set(x)
    adj_pad = jnp.zeros((n_pad, n_pad), dtype=adj.dtype).at[:n, :n].set(adj)
    colsum = jnp.sum(x_pad.astype(jnp.float32), axis=0, keepdims=True)  # (1, c_pad)

    kernel = functools.partial(
        _soft_contrastive_kernel,
        n_valid=n, n_pad=n_pad, inv_temp=1.0 / temperature, tm=tm, tn=tn)

    grid = (n_pad // tm, n_pad // tn)                # (row blocks, col blocks)
    unsup_rows, sup_rows = pl.pallas_call(
        kernel,
        out_shape=(
            jax.ShapeDtypeStruct((n_pad, 128), jnp.float32),
            jax.ShapeDtypeStruct((n_pad, 128), jnp.float32),
        ),
        grid=grid,
        in_specs=[
            # Full X resident in VMEM (DMA'd once, constant index_map); the
            # row/col MXU operands are sliced in-kernel, so X is never
            # re-streamed per row block.
            pl.BlockSpec((n_pad, c_pad), lambda i, j: (0, 0)),
            pl.BlockSpec((tm, tn), lambda i, j: (i, j)),      # streamed adj tile
            pl.BlockSpec((1, c_pad), lambda i, j: (0, 0)),    # tiny resident colsum
        ],
        out_specs=(
            pl.BlockSpec((tm, 128), lambda i, j: (i, 0)),
            pl.BlockSpec((tm, 128), lambda i, j: (i, 0)),
        ),
        scratch_shapes=[pltpu.VMEM((tm, 1), jnp.float32)] * 4,
        compiler_params=pltpu.CompilerParams(
            dimension_semantics=("parallel", "arbitrary"),
            vmem_limit_bytes=48 * 1024 * 1024),
    )(x_pad, adj_pad, colsum)

    per_row_unsup = unsup_rows[:, 0]                 # zeros on padded rows
    per_row_sup = sup_rows[:, 0]
    unsupervised = -jnp.sum(per_row_unsup) / (n * n)
    supervised = -temperature * jnp.sum(per_row_sup) / n   # base_temperature = 1.0
    return alpha * supervised + (1.0 - alpha) * unsupervised


def _reference_loss(features, adj, temperature=0.07, alpha=0.5):
    """Pure-JAX reference matching the PyTorch forward, for sanity checking."""
    batch, n_views, c = features.shape
    n = batch * n_views
    x = features.reshape(n, c).astype(jnp.float32)
    adj = adj.astype(jnp.float32)
    sim = (x @ x.T) / temperature
    logits = sim - jnp.max(sim, axis=1, keepdims=True)
    logits_mask = 1.0 - jnp.eye(n, dtype=jnp.float32)
    exp_logits = jnp.exp(logits) * logits_mask
    log_prob = logits - jnp.log(jnp.sum(exp_logits, axis=1, keepdims=True))
    unsup = -jnp.mean(log_prob)
    pos = (adj > 0).astype(jnp.float32)
    wm = adj * logits_mask * pos
    mpp = jnp.sum(wm, axis=1)
    mpp = jnp.where(mpp < 1e-6, 1.0, mpp)
    mlpp = jnp.sum(wm * log_prob, axis=1) / mpp
    sup = jnp.mean(-(temperature / 1.0) * mlpp)
    return alpha * sup + (1.0 - alpha) * unsup


if __name__ == "__main__":
    key = jax.random.PRNGKey(0)
    k1, k2 = jax.random.split(key)

    batch, n_views, C = 8, 2, 32
    N = batch * n_views

    # L2-normalized features, as contrastive losses expect; keeps the masked
    # softmax denominator away from f32 underflow.
    features = jax.random.normal(k1, (batch, n_views, C), dtype=jnp.float32)
    features = features / jnp.linalg.norm(features, axis=-1, keepdims=True)

    raw = jax.random.uniform(k2, (N, N), dtype=jnp.float32)
    adj = jnp.where(raw > 0.5, raw, 0.0)
    adj = 0.5 * (adj + adj.T)

    # bf16 inputs: halve the dominant adj HBM stream and use the bf16 MXU path.
    # The reference consumes the SAME quantized inputs, so the check isolates
    # kernel error from input quantization.
    features_bf16 = features.astype(jnp.bfloat16)
    adj_bf16 = adj.astype(jnp.bfloat16)

    loss_fn = jax.jit(soft_contrastive_loss, static_argnames=("temperature", "alpha"))
    loss = loss_fn(features_bf16, adj_bf16, temperature=0.07, alpha=0.5)
    loss = jax.block_until_ready(loss)

    ref = _reference_loss(features_bf16, adj_bf16, temperature=0.07, alpha=0.5)
    assert bool(jnp.isfinite(loss)), loss
    assert jnp.allclose(loss, ref, rtol=1e-3, atol=1e-3), (loss, ref)

    print("KERNEL_OK")
</pallas_src>

<mosaic_0001>
module attributes {stable_mosaic.version = 11 : i64} {
  func.func @_soft_contrastive_kernel(%arg0: i32, %arg1: i32, %arg2: memref<128x128xbf16, #tpu.memory_space<vmem>>, %arg3: memref<128x128xbf16, #tpu.memory_space<vmem>>, %arg4: memref<1x128xf32, #tpu.memory_space<vmem>>, %arg5: memref<128x128xf32, #tpu.memory_space<vmem>>, %arg6: memref<128x128xf32, #tpu.memory_space<vmem>>, %arg7: memref<128x1xf32, #tpu.memory_space<vmem>>, %arg8: memref<128x1xf32, #tpu.memory_space<vmem>>, %arg9: memref<128x1xf32, #tpu.memory_space<vmem>>, %arg10: memref<128x1xf32, #tpu.memory_space<vmem>>) attributes {dimension_semantics = [#tpu.dimension_semantics<parallel>, #tpu.dimension_semantics<arbitrary>], iteration_bounds = array<i64: 1, 1>, scalar_prefetch = 0 : i64, scratch_operands = 4 : i64, tpu.core_type = #tpu.core_type<tc>, window_params = [{pipeline_mode = #tpu.pipeline_mode<synchronous>, transform_indices = @transform_0, window_bounds = array<i64: 128, 128>}, {transform_indices = @transform_1, window_bounds = array<i64: 128, 128>}, {pipeline_mode = #tpu.pipeline_mode<synchronous>, transform_indices = @transform_2, window_bounds = array<i64: 1, 128>}, {transform_indices = @transform_3, window_bounds = array<i64: 128, 128>}, {transform_indices = @transform_4, window_bounds = array<i64: 128, 128>}]} {
    %c0_i32 = arith.constant 0 : i32
    %0 = arith.cmpi eq, %arg1, %c0_i32 : i32
    %1 = arith.extui %0 : i1 to i32
    %c0_i32_0 = arith.constant 0 : i32
    %2 = arith.cmpi ne, %1, %c0_i32_0 : i32
    scf.if %2 {
      %cst_17 = arith.constant 0xFF800000 : f32
      %37 = vector.broadcast %cst_17 : f32 to vector<128x1xf32>
      %c0_18 = arith.constant 0 : index
      %c0_19 = arith.constant 0 : index
      %38 = vector.load %arg7[%c0_18, %c0_19] : memref<128x1xf32, #tpu.memory_space<vmem>>, vector<128x1xf32>
      tpu.vector_store %arg7[%c0_18, %c0_19], %37 {strides = array<i32>} : memref<128x1xf32, #tpu.memory_space<vmem>>, vector<128x1xf32>,
      %cst_20 = arith.constant 0.000000e+00 : f32
      %39 = vector.broadcast %cst_20 : f32 to vector<128x1xf32>
      %c0_21 = arith.constant 0 : index
      %c0_22 = arith.constant 0 : index
      %40 = vector.load %arg8[%c0_21, %c0_22] : memref<128x1xf32, #tpu.memory_space<vmem>>, vector<128x1xf32>
      tpu.vector_store %arg8[%c0_21, %c0_22], %39 {strides = array<i32>} : memref<128x1xf32, #tpu.memory_space<vmem>>, vector<128x1xf32>,
      %cst_23 = arith.constant 0.000000e+00 : f32
      %41 = vector.broadcast %cst_23 : f32 to vector<128x1xf32>
      %c0_24 = arith.constant 0 : index
      %c0_25 = arith.constant 0 : index
      %42 = vector.load %arg9[%c0_24, %c0_25] : memref<128x1xf32, #tpu.memory_space<vmem>>, vector<128x1xf32>
      tpu.vector_store %arg9[%c0_24, %c0_25], %41 {strides = array<i32>} : memref<128x1xf32, #tpu.memory_space<vmem>>, vector<128x1xf32>,
      %cst_26 = arith.constant 0.000000e+00 : f32
      %43 = vector.broadcast %cst_26 : f32 to vector<128x1xf32>
      %c0_27 = arith.constant 0 : index
      %c0_28 = arith.constant 0 : index
      %44 = vector.load %arg10[%c0_27, %c0_28] : memref<128x1xf32, #tpu.memory_space<vmem>>, vector<128x1xf32>
      tpu.vector_store %arg10[%c0_27, %c0_28], %43 {strides = array<i32>} : memref<128x1xf32, #tpu.memory_space<vmem>>, vector<128x1xf32>,
    } else {
    }
    %c128_i32 = arith.constant 128 : i32
    %3 = arith.muli %arg0, %c128_i32 : i32
    %4 = tpu.assume_multiple %3, 128 : i32
    %c128_i32_1 = arith.constant 128 : i32
    %5 = arith.muli %arg1, %c128_i32_1 : i32
    %6 = tpu.assume_multiple %5, 128 : i32
    %7 = arith.index_cast %4 : i32 to index
    %c0 = arith.constant 0 : index
    %8 = vector.load %arg2[%7, %c0] : memref<128x128xbf16, #tpu.memory_space<vmem>>, vector<128x128xbf16>
    %9 = arith.index_cast %6 : i32 to index
    %c0_2 = arith.constant 0 : index
    %10 = vector.load %arg2[%9, %c0_2] : memref<128x128xbf16, #tpu.memory_space<vmem>>, vector<128x128xbf16>
    %cst = arith.constant dense<0.000000e+00> : vector<128x128xf32>
    %11 = tpu.matmul %8, %10, %cst {dimension_numbers = #tpu.dot_dimension_numbers<[1], [1], [0], [0], [0, 0, 1, 0], [], []>} : vector<128x128xbf16>, vector<128x128xbf16>, vector<128x128xf32> -> vector<128x128xf32>
    %cst_3 = arith.constant 14.2857141 : f32
    %12 = vector.broadcast %cst_3 : f32 to vector<128x128xf32>
    %13 = arith.mulf %11, %12 : vector<128x128xf32>
    %c0_4 = arith.constant 0 : index
    %c0_5 = arith.constant 0 : index
    %14 = vector.load %arg3[%c0_4, %c0_5] : memref<128x128xbf16, #tpu.memory_space<vmem>>, vector<128x128xbf16>
    %15 = arith.extf %14 : vector<128x128xbf16> to vector<128x128xf32>
    %c128_i32_6 = arith.constant 128 : i32
    %16 = arith.muli %arg0, %c128_i32_6 : i32
    %c1_i32 = arith.constant 1 : i32
    %17 = arith.addi %arg1, %c1_i32 : i32
    %c128_i32_7 = arith.constant 128 : i32
    %18 = arith.muli %17, %c128_i32_7 : i32
    %19 = arith.cmpi slt, %16, %18 : i32
    %c128_i32_8 = arith.constant 128 : i32
    %20 = arith.muli %arg1, %c128_i32_8 : i32
    %c1_i32_9 = arith.constant 1 : i32
    %21 = arith.addi %arg0, %c1_i32_9 : i32
    %c128_i32_10 = arith.constant 128 : i32
    %22 = arith.muli %21, %c128_i32_10 : i32
    %23 = arith.cmpi slt, %20, %22 : i32
    %24 = arith.andi %19, %23 : i1
    %c1_i32_11 = arith.constant 1 : i32
    %25 = arith.addi %arg1, %c1_i32_11 : i32
    %c128_i32_12 = arith.constant 128 : i32
    %26 = arith.muli %25, %c128_i32_12 : i32
    %c16_i32 = arith.constant 16 : i32
    %27 = arith.cmpi sgt, %26, %c16_i32 : i32
    %28 = arith.ori %24, %27 : i1
    %29 = arith.extui %28 : i1 to i32
    %c0_i32_13 = arith.constant 0 : i32
    %30 = arith.cmpi ne, %29, %c0_i32_13 : i32
    scf.if %30 {
      %37 = tpu.iota {dimensions = array<i32: 0>} : vector<128x128xi32>
      %38 = vector.broadcast %4 : i32 to vector<128x128xi32>
      %39 = arith.addi %38, %37 : vector<128x128xi32>
      %40 = tpu.iota {dimensions = array<i32: 1>} : vector<128x128xi32>
      %41 = vector.broadcast %6 : i32 to vector<128x128xi32>
      %42 = arith.addi %41, %40 : vector<128x128xi32>
      %c16_i32_17 = arith.constant 16 : i32
      %43 = vector.broadcast %c16_i32_17 : i32 to vector<128x128xi32>
      %44 = arith.cmpi slt, %42, %43 : vector<128x128xi32>
      %45 = arith.cmpi ne, %39, %42 : vector<128x128xi32>
      %cst_18 = arith.constant 0xFF800000 : f32
      %46 = vector.broadcast %cst_18 : f32 to vector<128x128xf32>
      %47 = arith.select %44, %13, %46 : vector<128x128xi1>, vector<128x128xf32>
      %48 = arith.andi %44, %45 : vector<128x128xi1>
      %cst_19 = arith.constant 0xFF800000 : f32
      %49 = vector.broadcast %cst_19 : f32 to vector<128x128xf32>
      %50 = arith.select %48, %13, %49 : vector<128x128xi1>, vector<128x128xf32>
      %cst_20 = arith.constant 0.000000e+00 : f32
      %51 = vector.broadcast %cst_20 : f32 to vector<128x128xf32>
      %52 = arith.cmpf ogt, %15, %51 : vector<128x128xf32>
      %53 = arith.andi %52, %45 : vector<128x128xi1>
      %cst_21 = arith.constant 0.000000e+00 : f32
      %54 = vector.broadcast %cst_21 : f32 to vector<128x128xf32>
      %55 = arith.select %53, %15, %54 : vector<128x128xi1>, vector<128x128xf32>
      %cst_22 = arith.constant dense<0xFF800000> : vector<128xf32>
      %56 = vector.multi_reduction <maximumf>, %47, %cst_22 [1] : vector<128x128xf32> to vector<128xf32>
      %57 = vector.shape_cast %56 : vector<128xf32> to vector<128x1xf32>
      %c0_23 = arith.constant 0 : index
      %c0_24 = arith.constant 0 : index
      %58 = vector.load %arg7[%c0_23, %c0_24] : memref<128x1xf32, #tpu.memory_space<vmem>>, vector<128x1xf32>
      %59 = arith.maximumf %58, %57 : vector<128x1xf32>
      %cst_25 = arith.constant 0xFF800000 : f32
      %60 = vector.broadcast %cst_25 : f32 to vector<128x1xf32>
      %61 = arith.cmpf oeq, %58, %60 : vector<128x1xf32>
      %62 = arith.subf %58, %59 : vector<128x1xf32>
      %63 = math.exp %62 : vector<128x1xf32>
      %cst_26 = arith.constant 0.000000e+00 : f32
      %64 = vector.broadcast %cst_26 : f32 to vector<128x1xf32>
      %65 = arith.select %61, %64, %63 : vector<128x1xi1>, vector<128x1xf32>
      %66 = vector.broadcast %59 : vector<128x1xf32> to vector<128x128xf32>
      %67 = arith.subf %50, %66 : vector<128x128xf32>
      %68 = math.exp %67 : vector<128x128xf32>
      %c0_27 = arith.constant 0 : index
      %c0_28 = arith.constant 0 : index
      %69 = vector.load %arg8[%c0_27, %c0_28] : memref<128x1xf32, #tpu.memory_space<vmem>>, vector<128x1xf32>
      %70 = arith.mulf %65, %69 : vector<128x1xf32>
      %cst_29 = arith.constant dense<0.000000e+00> : vector<128xf32>
      %71 = vector.multi_reduction <add>, %68, %cst_29 [1] : vector<128x128xf32> to vector<128xf32>
      %72 = vector.shape_cast %71 : vector<128xf32> to vector<128x1xf32>
      %73 = arith.addf %70, %72 : vector<128x1xf32>
      %c0_30 = arith.constant 0 : index
      %c0_31 = arith.constant 0 : index
      %74 = vector.load %arg8[%c0_30, %c0_31] : memref<128x1xf32, #tpu.memory_space<vmem>>, vector<128x1xf32>
      tpu.vector_store %arg8[%c0_30, %c0_31], %73 {strides = array<i32>} : memref<128x1xf32, #tpu.memory_space<vmem>>, vector<128x1xf32>,
      %c0_32 = arith.constant 0 : index
      %c0_33 = arith.constant 0 : index
      %75 = vector.load %arg7[%c0_32, %c0_33] : memref<128x1xf32, #tpu.memory_space<vmem>>, vector<128x1xf32>
      tpu.vector_store %arg7[%c0_32, %c0_33], %59 {strides = array<i32>} : memref<128x1xf32, #tpu.memory_space<vmem>>, vector<128x1xf32>,
      %c0_34 = arith.constant 0 : index
      %c0_35 = arith.constant 0 : index
      %76 = vector.load %arg9[%c0_34, %c0_35] : memref<128x1xf32, #tpu.memory_space<vmem>>, vector<128x1xf32>
      %cst_36 = arith.constant dense<0.000000e+00> : vector<128xf32>
      %77 = vector.multi_reduction <add>, %55, %cst_36 [1] : vector<128x128xf32> to vector<128xf32>
      %78 = vector.shape_cast %77 : vector<128xf32> to vector<128x1xf32>
      %79 = arith.addf %76, %78 : vector<128x1xf32>
      %c0_37 = arith.constant 0 : index
      %c0_38 = arith.constant 0 : index
      %80 = vector.load %arg9[%c0_37, %c0_38] : memref<128x1xf32, #tpu.memory_space<vmem>>, vector<128x1xf32>
      tpu.vector_store %arg9[%c0_37, %c0_38], %79 {strides = array<i32>} : memref<128x1xf32, #tpu.memory_space<vmem>>, vector<128x1xf32>,
      %c0_39 = arith.constant 0 : index
      %c0_40 = arith.constant 0 : index
      %81 = vector.load %arg10[%c0_39, %c0_40] : memref<128x1xf32, #tpu.memory_space<vmem>>, vector<128x1xf32>
      %82 = arith.mulf %55, %13 : vector<128x128xf32>
      %cst_41 = arith.constant dense<0.000000e+00> : vector<128xf32>
      %83 = vector.multi_reduction <add>, %82, %cst_41 [1] : vector<128x128xf32> to vector<128xf32>
      %84 = vector.shape_cast %83 : vector<128xf32> to vector<128x1xf32>
      %85 = arith.addf %81, %84 : vector<128x1xf32>
      %c0_42 = arith.constant 0 : index
      %c0_43 = arith.constant 0 : index
      %86 = vector.load %arg10[%c0_42, %c0_43] : memref<128x1xf32, #tpu.memory_space<vmem>>, vector<128x1xf32>
      tpu.vector_store %arg10[%c0_42, %c0_43], %85 {strides = array<i32>} : memref<128x1xf32, #tpu.memory_space<vmem>>, vector<128x1xf32>,
    } else {
    }
    %true = arith.constant true
    %31 = arith.xori %28, %true : i1
    %32 = arith.extui %31 : i1 to i32
    %c0_i32_14 = arith.constant 0 : i32
    %33 = arith.cmpi ne, %32, %c0_i32_14 : i32
    scf.if %33 {
      %cst_17 = arith.constant 0.000000e+00 : f32
      %37 = vector.broadcast %cst_17 : f32 to vector<128x128xf32>
      %38 = arith.cmpf ogt, %15, %37 : vector<128x128xf32>
      %cst_18 = arith.constant 0.000000e+00 : f32
      %39 = vector.broadcast %cst_18 : f32 to vector<128x128xf32>
      %40 = arith.select %38, %15, %39 : vector<128x128xi1>, vector<128x128xf32>
      %cst_19 = arith.constant dense<0xFF800000> : vector<128xf32>
      %41 = vector.multi_reduction <maximumf>, %13, %cst_19 [1] : vector<128x128xf32> to vector<128xf32>
      %42 = vector.shape_cast %41 : vector<128xf32> to vector<128x1xf32>
      %c0_20 = arith.constant 0 : index
      %c0_21 = arith.constant 0 : index
      %43 = vector.load %arg7[%c0_20, %c0_21] : memref<128x1xf32, #tpu.memory_space<vmem>>, vector<128x1xf32>
      %44 = arith.maximumf %43, %42 : vector<128x1xf32>
      %cst_22 = arith.constant 0xFF800000 : f32
      %45 = vector.broadcast %cst_22 : f32 to vector<128x1xf32>
      %46 = arith.cmpf oeq, %43, %45 : vector<128x1xf32>
      %47 = arith.subf %43, %44 : vector<128x1xf32>
      %48 = math.exp %47 : vector<128x1xf32>
      %cst_23 = arith.constant 0.000000e+00 : f32
      %49 = vector.broadcast %cst_23 : f32 to vector<128x1xf32>
      %50 = arith.select %46, %49, %48 : vector<128x1xi1>, vector<128x1xf32>
      %51 = vector.broadcast %44 : vector<128x1xf32> to vector<128x128xf32>
      %52 = arith.subf %13, %51 : vector<128x128xf32>
      %53 = math.exp %52 : vector<128x128xf32>
      %c0_24 = arith.constant 0 : index
      %c0_25 = arith.constant 0 : index
      %54 = vector.load %arg8[%c0_24, %c0_25] : memref<128x1xf32, #tpu.memory_space<vmem>>, vector<128x1xf32>
      %55 = arith.mulf %50, %54 : vector<128x1xf32>
      %cst_26 = arith.constant dense<0.000000e+00> : vector<128xf32>
      %56 = vector.multi_reduction <add>, %53, %cst_26 [1] : vector<128x128xf32> to vector<128xf32>
      %57 = vector.shape_cast %56 : vector<128xf32> to vector<128x1xf32>
      %58 = arith.addf %55, %57 : vector<128x1xf32>
      %c0_27 = arith.constant 0 : index
      %c0_28 = arith.constant 0 : index
      %59 = vector.load %arg8[%c0_27, %c0_28] : memref<128x1xf32, #tpu.memory_space<vmem>>, vector<128x1xf32>
      tpu.vector_store %arg8[%c0_27, %c0_28], %58 {strides = array<i32>} : memref<128x1xf32, #tpu.memory_space<vmem>>, vector<128x1xf32>,
      %c0_29 = arith.constant 0 : index
      %c0_30 = arith.constant 0 : index
      %60 = vector.load %arg7[%c0_29, %c0_30] : memref<128x1xf32, #tpu.memory_space<vmem>>, vector<128x1xf32>
      tpu.vector_store %arg7[%c0_29, %c0_30], %44 {strides = array<i32>} : memref<128x1xf32, #tpu.memory_space<vmem>>, vector<128x1xf32>,
      %c0_31 = arith.constant 0 : index
      %c0_32 = arith.constant 0 : index
      %61 = vector.load %arg9[%c0_31, %c0_32] : memref<128x1xf32, #tpu.memory_space<vmem>>, vector<128x1xf32>
      %cst_33 = arith.constant dense<0.000000e+00> : vector<128xf32>
      %62 = vector.multi_reduction <add>, %40, %cst_33 [1] : vector<128x128xf32> to vector<128xf32>
      %63 = vector.shape_cast %62 : vector<128xf32> to vector<128x1xf32>
      %64 = arith.addf %61, %63 : vector<128x1xf32>
      %c0_34 = arith.constant 0 : index
      %c0_35 = arith.constant 0 : index
      %65 = vector.load %arg9[%c0_34, %c0_35] : memref<128x1xf32, #tpu.memory_space<vmem>>, vector<128x1xf32>
      tpu.vector_store %arg9[%c0_34, %c0_35], %64 {strides = array<i32>} : memref<128x1xf32, #tpu.memory_space<vmem>>, vector<128x1xf32>,
      %c0_36 = arith.constant 0 : index
      %c0_37 = arith.constant 0 : index
      %66 = vector.load %arg10[%c0_36, %c0_37] : memref<128x1xf32, #tpu.memory_space<vmem>>, vector<128x1xf32>
      %67 = arith.mulf %40, %13 : vector<128x128xf32>
      %cst_38 = arith.constant dense<0.000000e+00> : vector<128xf32>
      %68 = vector.multi_reduction <add>, %67, %cst_38 [1] : vector<128x128xf32> to vector<128xf32>
      %69 = vector.shape_cast %68 : vector<128xf32> to vector<128x1xf32>
      %70 = arith.addf %66, %69 : vector<128x1xf32>
      %c0_39 = arith.constant 0 : index
      %c0_40 = arith.constant 0 : index
      %71 = vector.load %arg10[%c0_39, %c0_40] : memref<128x1xf32, #tpu.memory_space<vmem>>, vector<128x1xf32>
      tpu.vector_store %arg10[%c0_39, %c0_40], %70 {strides = array<i32>} : memref<128x1xf32, #tpu.memory_space<vmem>>, vector<128x1xf32>,
    } else {
    }
    %c0_i32_15 = arith.constant 0 : i32
    %34 = arith.cmpi eq, %arg1, %c0_i32_15 : i32
    %35 = arith.extui %34 : i1 to i32
    %c0_i32_16 = arith.constant 0 : i32
    %36 = arith.cmpi ne, %35, %c0_i32_16 : i32
    scf.if %36 {
      %c0_17 = arith.constant 0 : index
      %c0_18 = arith.constant 0 : index
      %37 = vector.load %arg7[%c0_17, %c0_18] : memref<128x1xf32, #tpu.memory_space<vmem>>, vector<128x1xf32>
      %c0_19 = arith.constant 0 : index
      %c0_20 = arith.constant 0 : index
      %38 = vector.load %arg8[%c0_19, %c0_20] : memref<128x1xf32, #tpu.memory_space<vmem>>, vector<128x1xf32>
      %39 = math.log %38 : vector<128x1xf32>
      %40 = arith.addf %37, %39 : vector<128x1xf32>
      %41 = tpu.iota {dimensions = array<i32: 0>} : vector<128x1xi32>
      %42 = vector.broadcast %4 : i32 to vector<128x1xi32>
      %43 = arith.addi %42, %41 : vector<128x1xi32>
      %c16_i32_21 = arith.constant 16 : i32
      %44 = vector.broadcast %c16_i32_21 : i32 to vector<128x1xi32>
      %45 = arith.cmpi slt, %43, %44 : vector<128x1xi32>
      %46 = arith.extf %8 : vector<128x128xbf16> to vector<128x128xf32>
      %c0_22 = arith.constant 0 : index
      %c0_23 = arith.constant 0 : index
      %47 = vector.load %arg4[%c0_22, %c0_23] : memref<1x128xf32, #tpu.memory_space<vmem>>, vector<1x128xf32>
      %48 = vector.broadcast %47 : vector<1x128xf32> to vector<128x128xf32>
      %49 = arith.mulf %46, %48 : vector<128x128xf32>
      %cst_24 = arith.constant dense<0.000000e+00> : vector<128xf32>
      %50 = vector.multi_reduction <add>, %49, %cst_24 [1] : vector<128x128xf32> to vector<128xf32>
      %51 = vector.shape_cast %50 : vector<128xf32> to vector<128x1xf32>
      %cst_25 = arith.constant 14.2857141 : f32
      %52 = vector.broadcast %cst_25 : f32 to vector<128x1xf32>
      %53 = arith.mulf %52, %51 : vector<128x1xf32>
      %cst_26 = arith.constant 1.600000e+01 : f32
      %54 = vector.broadcast %cst_26 : f32 to vector<128x1xf32>
      %55 = arith.mulf %54, %40 : vector<128x1xf32>
      %56 = arith.subf %53, %55 : vector<128x1xf32>
      %cst_27 = arith.constant 0.000000e+00 : f32
      %57 = vector.broadcast %cst_27 : f32 to vector<128x1xf32>
      %58 = arith.select %45, %56, %57 : vector<128x1xi1>, vector<128x1xf32>
      %c0_28 = arith.constant 0 : index
      %c0_29 = arith.constant 0 : index
      %59 = vector.load %arg9[%c0_28, %c0_29] : memref<128x1xf32, #tpu.memory_space<vmem>>, vector<128x1xf32>
      %cst_30 = arith.constant 9.99999997E-7 : f32
      %60 = vector.broadcast %cst_30 : f32 to vector<128x1xf32>
      %61 = arith.cmpf olt, %59, %60 : vector<128x1xf32>
      %c0_31 = arith.constant 0 : index
      %c0_32 = arith.constant 0 : index
      %62 = vector.load %arg9[%c0_31, %c0_32] : memref<128x1xf32, #tpu.memory_space<vmem>>, vector<128x1xf32>
      %cst_33 = arith.constant 1.000000e+00 : f32
      %63 = vector.broadcast %cst_33 : f32 to vector<128x1xf32>
      %64 = arith.select %61, %63, %62 : vector<128x1xi1>, vector<128x1xf32>
      %c0_34 = arith.constant 0 : index
      %c0_35 = arith.constant 0 : index
      %65 = vector.load %arg10[%c0_34, %c0_35] : memref<128x1xf32, #tpu.memory_space<vmem>>, vector<128x1xf32>
      %c0_36 = arith.constant 0 : index
      %c0_37 = arith.constant 0 : index
      %66 = vector.load %arg9[%c0_36, %c0_37] : memref<128x1xf32, #tpu.memory_space<vmem>>, vector<128x1xf32>
      %67 = arith.mulf %66, %40 : vector<128x1xf32>
      %68 = arith.subf %65, %67 : vector<128x1xf32>
      %69 = arith.divf %68, %64 : vector<128x1xf32>
      %cst_38 = arith.constant 0.000000e+00 : f32
      %70 = vector.broadcast %cst_38 : f32 to vector<128x1xf32>
      %71 = arith.select %45, %69, %70 : vector<128x1xi1>, vector<128x1xf32>
      %72 = vector.shape_cast %58 : vector<128x1xf32> to vector<128x1xf32>
      %73 = vector.broadcast %72 : vector<128x1xf32> to vector<128x128xf32>
      %c0_39 = arith.constant 0 : index
      %c0_40 = arith.constant 0 : index
      %74 = vector.load %arg5[%c0_39, %c0_40] : memref<128x128xf32, #tpu.memory_space<vmem>>, vector<128x128xf32>
      tpu.vector_store %arg5[%c0_39, %c0_40], %73 {strides = array<i32>} : memref<128x128xf32, #tpu.memory_space<vmem>>, vector<128x128xf32>,
      %75 = vector.shape_cast %71 : vector<128x1xf32> to vector<128x1xf32>
      %76 = vector.broadcast %75 : vector<128x1xf32> to vector<128x128xf32>
      %c0_41 = arith.constant 0 : index
      %c0_42 = arith.constant 0 : index
      %77 = vector.load %arg6[%c0_41, %c0_42] : memref<128x128xf32, #tpu.memory_space<vmem>>, vector<128x128xf32>
      tpu.vector_store %arg6[%c0_41, %c0_42], %76 {strides = array<i32>} : memref<128x128xf32, #tpu.memory_space<vmem>>, vector<128x128xf32>,
    } else {
    }
    return
  }
  func.func @transform_0(%arg0: i32, %arg1: i32) -> (i32, i32) {
    %c0_i32 = arith.constant 0 : i32
    %c0_i32_0 = arith.constant 0 : i32
    %c0_i32_1 = arith.constant 0 : i32
    return %c0_i32, %c0_i32_0 : i32, i32
  }
  func.func @transform_1(%arg0: i32, %arg1: i32) -> (i32, i32) {
    %c0_i32 = arith.constant 0 : i32
    return %arg0, %arg1 : i32, i32
  }
  func.func @transform_2(%arg0: i32, %arg1: i32) -> (i32, i32) {
    %c0_i32 = arith.constant 0 : i32
    %c0_i32_0 = arith.constant 0 : i32
    %c0_i32_1 = arith.constant 0 : i32
    return %c0_i32, %c0_i32_0 : i32, i32
  }
  func.func @transform_3(%arg0: i32, %arg1: i32) -> (i32, i32) {
    %c0_i32 = arith.constant 0 : i32
    %c0_i32_0 = arith.constant 0 : i32
    return %arg0, %c0_i32 : i32, i32
  }
  func.func @transform_4(%arg0: i32, %arg1: i32) -> (i32, i32) {
    %c0_i32 = arith.constant 0 : i32
    %c0_i32_0 = arith.constant 0 : i32
    return %arg0, %c0_i32 : i32, i32
  }
}

</mosaic_0001>

<bundles_post_ra>
// kernel: soft_contrastive_loss.1
= control target key start
LH: loop header
LB: loop body
LE: loop exit
PB: predicated region body
PF: predicated region fallthrough
CT: control target
= control target key end

     0   :  { %v333_v3 = vlaneseq  ;;  %s3624_s0 = inlined_call_operand.vmem [shape: bf16[128,128], index: 0, kind: input, shape index: {}]   ;;  %s3625_s2 = inlined_call_operand.vmem [shape: f32[1,128], index: 2, kind: input, shape index: {}]   ;;  %s3626_s1 = inlined_call_operand.vmem [shape: bf16[128,128], index: 1, kind: input, shape index: {}]   ;;  %s3627_s3 = inlined_call_operand.vmem [shape: f32[128,128], index: 3, kind: output, shape index: {0}]   ;;  %s3628_s4 = inlined_call_operand.vmem [shape: f32[128,128], index: 4, kind: output, shape index: {1}]  }
   0x1   :  { %v2541_v0 = vld [vmem:[%s3624_s0 + $0x38] sm:$0xff]  ;;  %v2540_v1 = vld [vmem:[%s3624_s0 + $0x30] sm:$0xff]  ;;  %v2539_v2 = vld [vmem:[%s3624_s0 + $0x28] sm:$0xff] }
   0x2   :  { %223 = vmatpush.bf16.xpose.msra.mxu0 %v2541_v0  ;;  %2581 = vmatpush.bf16.xpose.msra.mxu1 %v2541_v0  ;;  %v2543_v4 = vld [vmem:[%s3626_s1] sm:$0xff]   ;;  %v2794_v6 = vshrl.u32 %v333_v3, 7  ;;  %v2796_v7 = vand.u32 127, %v333_v3  ;;  %v2574_v10 = vld [vmem:[%s3626_s1 + $0x8] sm:$0xff]   ;;  %v2537_v19 = vld [vmem:[%s3624_s0 + $0x18] sm:$0xff] }
   0x3   :  { %2582 = vmatpush.bf16.xpose.msra.mxu2 %v2541_v0  ;;  %2583 = vmatpush.bf16.xpose.msra.mxu3 %v2541_v0  ;;  %v2544_v5 = vunpack.c.l.bf16 %v2543_v4  ;;  %v2538_v9 = vld [vmem:[%s3624_s0 + $0x20] sm:$0xff]  ;;  %v2548_v11 = vunpack.c.l.bf16 %v2574_v10  ;;  %v2549_v13 = vunpack.c.h.bf16 %v2574_v10  ;;  %v2545_v15 = vunpack.c.h.bf16 %v2543_v4  ;;  %v2575_v21 = vld [vmem:[%s3626_s1 + $0x10] sm:$0xff]   ;;  %v2576_v22 = vld [vmem:[%s3626_s1 + $0x18] sm:$0xff]  }
   0x4   :  { %vm372_vm0 = vcmp.ne.s32.totalorder %v2794_v6, %v2796_v7  ;;  %v2813_v12 = vadd.s32 16, %v2794_v6  ;;  %v2816_v14 = vadd.s32 24, %v2794_v6  ;;  %v2826_v16 = vadd.s32 8, %v2794_v6  ;;  %v2577_v27 = vld [vmem:[%s3626_s1 + $0x20] sm:$0xff]   ;;  %v2894_v37 = vld [vmem:[%s3626_s1 + $0x28] sm:$0xff]   ;;  %v2536_v38 = vld [vmem:[%s3624_s0 + $0x10] sm:$0xff] }
   0x5   :  { %vm436_vm1 = vcmp.gt.f32.partialorder %v2544_v5, 0.0  ;;  %vm438_vm4 = vcmp.gt.f32.partialorder %v2548_v11, 0.0  ;;  %vm439_vm6 = vcmp.gt.f32.partialorder %v2549_v13, 0.0  ;;  %vm437_vm10 = vcmp.gt.f32.partialorder %v2545_v15, 0.0  ;;  %v2911_v40 = vld [vmem:[%s3626_s1 + $0x30] sm:$0xff]   ;;  %v2580_v51 = vld [vmem:[%s3626_s1 + $0x38] sm:$0xff]  }
   0x6   :  { %vm452_vm2 = vmand %vm436_vm1, %vm372_vm0  ;;  %vm3634_vm3 = vcmp.ne.s32.totalorder %v2813_v12, %v2796_v7  ;;  %vm3630_vm5 = vcmp.ne.s32.totalorder %v2816_v14, %v2796_v7  ;;  %vm373_vm9 = vcmp.ne.s32.totalorder %v2826_v16, %v2796_v7  ;;  %v2553_v23 = vunpack.c.h.bf16 %v2575_v21  ;;  %v2535_v52 = vld [vmem:[%s3624_s0 + $0x8] sm:$0xff]  ;;  %v92_v57 = vld [vmem:[%s3624_s0] sm:$0xff]  }
   0x7   :  { %v2803_v8 = vsel %vm452_vm2, %v2544_v5, 0.0  ;;  %vm454_vm7 = vmand %vm438_vm4, %vm3634_vm3  ;;  %v2855_v24 = vadd.s32 40, %v2794_v6  ;;  %v2556_v25 = vunpack.c.l.bf16 %v2576_v22  ;;  %v2858_v26 = vadd.s32 48, %v2794_v6  ;;  %v2681_v58 = vld [vmem:[%s3625_s2] ss:$0 sm:$0xff] }
   0x8   :  { %885 = vadd.xlane.f32.xlu1 %v2803_v8  ;;  %v2828_v17 = vsel %vm454_vm7, %v2548_v11, 0.0  ;;  %vm455_vm8 = vmand %vm439_vm6, %vm3630_vm5  ;;  %vm441_vm13 = vcmp.gt.f32.partialorder %v2553_v23, 0.0  ;;  %v2552_v28 = vunpack.c.l.bf16 %v2575_v21  ;;  %v2871_v29 = vadd.s32 32, %v2794_v6  ;;  %v2530_v21 = vld [vmem:[%s3624_s0 + $0x20] sm:$0xff] }
   0x9   :  { %889 = vadd.xlane.f32.xlu0 %v2828_v17  ;;  %v2834_v18 = vsel %vm455_vm8, %v2549_v13, 0.0  ;;  %vm453_vm11 = vmand %vm437_vm10, %vm373_vm9  ;;  %vm377_vm12 = vcmp.ne.s32.totalorder %v2855_v24, %v2796_v7  ;;  %vm3633_vm14 = vcmp.ne.s32.totalorder %v2858_v26, %v2796_v7  ;;  %vm442_vm15 = vcmp.gt.f32.partialorder %v2556_v25, 0.0  ;;  %v2526_v13 = vld [vmem:[%s3624_s0] sm:$0xff] }
   0xa   :  { %224 = vmatpush.bf16.xpose.msra.mxu0 %v2540_v1  ;;  %2584 = vmatpush.bf16.xpose.msra.mxu1 %v2540_v1  ;;  %v2845_v20 = vsel %vm453_vm11, %v2545_v15, 0.0  ;;  %vm457_vm1 = vmand %vm441_vm13, %vm377_vm12  ;;  %v2560_v30 = vunpack.c.l.bf16 %v2577_v27  ;;  %v2874_v31 = vadd.s32 64, %v2794_v6  ;;  %v2561_v33 = vunpack.c.h.bf16 %v2577_v27  ;;  %v2528_v15 = vld [vmem:[%s3624_s0 + $0x10] sm:$0xff]  ;;  %v2531_v27 = vld [vmem:[%s3624_s0 + $0x28] sm:$0xff] }
   0xb   :  { %2585 = vmatpush.bf16.xpose.msra.mxu2 %v2540_v1  ;;  %2586 = vmatpush.bf16.xpose.msra.mxu3 %v2540_v1  ;;  %v2876_v32 = vsel %vm457_vm1, %v2553_v23, 0.0  ;;  %vm458_vm2 = vmand %vm442_vm15, %vm3633_vm14  ;;  %v2882_v34 = vadd.s32 72, %v2794_v6  ;;  %v2557_v35 = vunpack.c.h.bf16 %v2576_v22  ;;  %vm376_vm4 = vcmp.ne.s32.totalorder %v2871_v29, %v2796_v7  ;;  %v2532_v22 = vld [vmem:[%s3624_s0 + $0x30] sm:$0xff]  ;;  %v2527_v23 = vld [vmem:[%s3624_s0 + $0x8] sm:$0xff] }
   0xc   :  { %887 = vadd.xlane.f32.xlu2 %v2845_v20  ;;  %v2885_v36 = vsel %vm458_vm2, %v2556_v25, 0.0  ;;  %vm440_vm6 = vcmp.gt.f32.partialorder %v2552_v28, 0.0  ;;  %vm380_vm7 = vcmp.ne.s32.totalorder %v2874_v31, %v2796_v7  ;;  %vm444_vm10 = vcmp.gt.f32.partialorder %v2560_v30, 0.0  ;;  %v2529_v25 = vld [vmem:[%s3624_s0 + $0x18] sm:$0xff] }
   0xd   :  { %vm456_vm8 = vmand %vm440_vm6, %vm376_vm4  ;;  %vm381_vm11 = vcmp.ne.s32.totalorder %v2882_v34, %v2796_v7  ;;  %vm445_vm13 = vcmp.gt.f32.partialorder %v2561_v33, 0.0  ;;  %v2906_v39 = vadd.s32 56, %v2794_v6  ;;  %vm443_vm1 = vcmp.gt.f32.partialorder %v2557_v35, 0.0 }
   0xe   :  { %v2913_v41 = vsel %vm456_vm8, %v2552_v28, 0.0  ;;  %vm460_vm15 = vmand %vm444_vm10, %vm380_vm7  ;;  %v2565_v42 = vunpack.c.h.bf16 %v2894_v37  ;;  %v2926_v43 = vadd.s32 88, %v2794_v6  ;;  %v2568_v44 = vunpack.c.l.bf16 %v2911_v40  ;;  %v2533_v28 = vld [vmem:[%s3624_s0 + $0x38] sm:$0xff] }
   0xf   :  { %vm461_vm2 = vmand %vm445_vm13, %vm381_vm11  ;;  %vm3629_vm6 = vcmp.ne.s32.totalorder %v2906_v39, %v2796_v7  ;;  %v2930_v45 = vadd.s32 96, %v2794_v6  ;;  %v2932_v46 = vsel %vm460_vm15, %v2560_v30, 0.0  ;;  %v2564_v48 = vunpack.c.l.bf16 %v2894_v37 }
  0x10   :  { %891 = vadd.xlane.f32.xlu1 %v2834_v18  ;;  %vm459_vm8 = vmand %vm443_vm1, %vm3629_vm6  ;;  %v2937_v47 = vsel %vm461_vm2, %v2561_v33, 0.0  ;;  %v2941_v49 = vadd.s32 80, %v2794_v6  ;;  %vm3632_vm10 = vcmp.ne.s32.totalorder %v2926_v43, %v2796_v7  ;;  %vm447_vm13 = vcmp.gt.f32.partialorder %v2565_v42, 0.0 }
  0x11   :  { %895 = vadd.xlane.f32.xlu0 %v2876_v32  ;;  %v2946_v50 = vsel %vm459_vm8, %v2557_v35, 0.0  ;;  %vm384_vm15 = vcmp.ne.s32.totalorder %v2930_v45, %v2796_v7  ;;  %vm448_vm1 = vcmp.gt.f32.partialorder %v2568_v44, 0.0  ;;  %vm463_vm2 = vmand %vm447_vm13, %vm3632_vm10  ;;  %vm446_vm6 = vcmp.gt.f32.partialorder %v2564_v48, 0.0 }
  0x12   :  { %225 = vmatpush.bf16.xpose.msra.mxu0 %v2539_v2  ;;  %2587 = vmatpush.bf16.xpose.msra.mxu1 %v2539_v2  ;;  %vm3631_vm8 = vcmp.ne.s32.totalorder %v2941_v49, %v2796_v7  ;;  %vm464_vm5 = vmand %vm448_vm1, %vm384_vm15  ;;  %v2572_v53 = vunpack.c.l.bf16 %v2580_v51  ;;  %v2967_v54 = vadd.s32 112, %v2794_v6  ;;  %v2573_v55 = vunpack.c.h.bf16 %v2580_v51 }
  0x13   :  { %2588 = vmatpush.bf16.xpose.msra.mxu2 %v2539_v2  ;;  %2589 = vmatpush.bf16.xpose.msra.mxu3 %v2539_v2  ;;  %v2970_v56 = vadd.s32 120, %v2794_v6  ;;  %v2978_v59 = vsel %vm463_vm2, %v2565_v42, 0.0  ;;  %vm2983_vm13 = vmand %vm446_vm6, %vm3631_vm8  ;;  %v1775_v61 = vunpack.c.h.bf16 %v92_v57  ;;  %v1774_v62 = vunpack.c.l.bf16 %v92_v57 }
  0x14   :  { %893 = vadd.xlane.f32.xlu2 %v2913_v41  ;;  %v2987_v63 = vsel %vm464_vm5, %v2568_v44, 0.0  ;;  %v2569_v0 = vunpack.c.h.bf16 %v2911_v40  ;;  %v2991_v1 = vadd.s32 104, %v2794_v6  ;;  %vm386_vm1 = vcmp.ne.s32.totalorder %v2967_v54, %v2796_v7 }
  0x15   :  { %vm450_vm2 = vcmp.gt.f32.partialorder %v2572_v53, 0.0  ;;  %v1795_v2 = vmul.f32 %v2681_v58, %v1775_v61  ;;  %v1794_v3 = vmul.f32 %v2681_v58, %v1774_v62  ;;  %v2754_v4 = vmov 0  }
  0x16   :  { %2614 = vset.pattern.permute.xlu0 %v2754_v4  ;;  %2608 = vset.pattern.permute.xlu1 %v2754_v4  ;;  %v2998_v5 = vsel %vm2983_vm13, %v2564_v48, 0.0  ;;  %vm387_vm5 = vcmp.ne.s32.totalorder %v2970_v56, %v2796_v7  ;;  %vm451_vm6 = vcmp.gt.f32.partialorder %v2573_v55, 0.0  ;;  %vm466_vm8 = vmand %vm450_vm2, %vm386_vm1  ;;  %vm385_vm10 = vcmp.ne.s32.totalorder %v2991_v1, %v2796_v7 }
  0x17   :  { %2620 = vset.pattern.permute.xlu2 %v2754_v4  ;;  %vm449_vm13 = vcmp.gt.f32.partialorder %v2569_v0, 0.0  ;;  %vm467_vm14 = vmand %vm451_vm6, %vm387_vm5  ;;  %v3015_v10 = vsel %vm466_vm8, %v2572_v53, 0.0  ;;  %v3635_v30 = vmov 0.0  }
  0x18   :  { %897 = vadd.xlane.f32.xlu1 %v2885_v36  ;;  %vm465_vm3 = vmand %vm449_vm13, %vm385_vm10  ;;  %v3020_v11 = vsel %vm467_vm14, %v2573_v55, 0.0  ;;  %vm371_vm14 = vcmp.lt.s32.totalorder %v2796_v7, 16 }
  0x19   :  { %901 = vadd.xlane.f32.xlu0 %v2932_v46 }
  0x1a   :  { %226 = vmatpush.bf16.xpose.msra.mxu0 %v2538_v9  ;;  %2590 = vmatpush.bf16.xpose.msra.mxu1 %v2538_v9 }
  0x1b   :  { %2591 = vmatpush.bf16.xpose.msra.mxu2 %v2538_v9  ;;  %2592 = vmatpush.bf16.xpose.msra.mxu3 %v2538_v9  ;;  %v2534_v9 = vld [vmem:[%s3624_s0] sm:$0xff] }
  0x1c   :  { %899 = vadd.xlane.f32.xlu2 %v2946_v50 }
  0x20   :  { %903 = vadd.xlane.f32.xlu1 %v2937_v47 }
  0x21   :  { %907 = vadd.xlane.f32.xlu0 %v2978_v59 }
  0x22   :  { %227 = vmatpush.bf16.xpose.msra.mxu0 %v2537_v19  ;;  %2593 = vmatpush.bf16.xpose.msra.mxu1 %v2537_v19 }
  0x23   :  { %2594 = vmatpush.bf16.xpose.msra.mxu2 %v2537_v19  ;;  %2595 = vmatpush.bf16.xpose.msra.mxu3 %v2537_v19  ;;  %v3029_v19 = vsel %vm465_vm3, %v2569_v0, 0.0  ;;  %vm20_vm3 = vcmask 7168  }
  0x24   :  { %905 = vadd.xlane.f32.xlu2 %v2998_v5  ;;  %53 = vst.msk [vmem:[#allocation4] sm:$0xff] %vm20_vm3, %v3635_v30 }
  0x25   :  { %37 = vst.msk [vmem:[#allocation3] sm:$0xff] %vm20_vm3, %v3635_v30 }
  0x26   :  { %38 = vst.msk [vmem:[#allocation3 + $0x8] sm:$0xff] %vm20_vm3, %v3635_v30 }
  0x27   :  { %39 = vst.msk [vmem:[#allocation3 + $0x10] sm:$0xff] %vm20_vm3, %v3635_v30 }
  0x28   :  { %909 = vadd.xlane.f32.xlu1 %v2987_v63  ;;  %40 = vst.msk [vmem:[#allocation3 + $0x18] sm:$0xff] %vm20_vm3, %v3635_v30 }
  0x29   :  { %913 = vadd.xlane.f32.xlu0 %v3015_v10  ;;  %41 = vst.msk [vmem:[#allocation3 + $0x20] sm:$0xff] %vm20_vm3, %v3635_v30 }
  0x2a   :  { %228 = vmatpush.bf16.xpose.msra.mxu0 %v2536_v38  ;;  %2596 = vmatpush.bf16.xpose.msra.mxu1 %v2536_v38  ;;  %42 = vst.msk [vmem:[#allocation3 + $0x28] sm:$0xff] %vm20_vm3, %v3635_v30 }
  0x2b   :  { %2597 = vmatpush.bf16.xpose.msra.mxu2 %v2536_v38  ;;  %2598 = vmatpush.bf16.xpose.msra.mxu3 %v2536_v38  ;;  %43 = vst.msk [vmem:[#allocation3 + $0x30] sm:$0xff] %vm20_vm3, %v3635_v30  ;;  %v869_v33 = vld [vmem:[#allocation4] sm:$0xff] }
  0x2c   :  { %911 = vadd.xlane.f32.xlu2 %v3029_v19  ;;  %44 = vst.msk [vmem:[#allocation3 + $0x38] sm:$0xff] %vm20_vm3, %v3635_v30 }
  0x2d   :  { %45 = vst.msk [vmem:[#allocation3 + $0x40] sm:$0xff] %vm20_vm3, %v3635_v30 }
  0x2e   :  { %46 = vst.msk [vmem:[#allocation3 + $0x48] sm:$0xff] %vm20_vm3, %v3635_v30 }
  0x2f   :  { %47 = vst.msk [vmem:[#allocation3 + $0x50] sm:$0xff] %vm20_vm3, %v3635_v30 }
  0x30   :  { %915 = vadd.xlane.f32.xlu1 %v3020_v11  ;;  %48 = vst.msk [vmem:[#allocation3 + $0x58] sm:$0xff] %vm20_vm3, %v3635_v30 }
  0x31   :  { %1810 = vadd.xlane.f32.xlu0 %v1794_v3  ;;  %49 = vst.msk [vmem:[#allocation3 + $0x60] sm:$0xff] %vm20_vm3, %v3635_v30 }
  0x32   :  { %229 = vmatpush.bf16.xpose.msra.mxu0 %v2535_v52  ;;  %2599 = vmatpush.bf16.xpose.msra.mxu1 %v2535_v52  ;;  %50 = vst.msk [vmem:[#allocation3 + $0x68] sm:$0xff] %vm20_vm3, %v3635_v30 }
  0x33   :  { %2600 = vmatpush.bf16.xpose.msra.mxu2 %v2535_v52  ;;  %2601 = vmatpush.bf16.xpose.msra.mxu3 %v2535_v52  ;;  %51 = vst.msk [vmem:[#allocation3 + $0x70] sm:$0xff] %vm20_vm3, %v3635_v30 }
  0x34   :  { %52 = vst.msk [vmem:[#allocation3 + $0x78] sm:$0xff] %vm20_vm3, %v3635_v30 }
  0x35   :  { %54 = vst.msk [vmem:[#allocation4 + $0x8] sm:$0xff] %vm20_vm3, %v3635_v30 }
  0x36   :  { %55 = vst.msk [vmem:[#allocation4 + $0x10] sm:$0xff] %vm20_vm3, %v3635_v30 }
  0x37   :  { %56 = vst.msk [vmem:[#allocation4 + $0x18] sm:$0xff] %vm20_vm3, %v3635_v30 }
  0x38   :  { %1812 = vadd.xlane.f32.xlu1 %v1795_v2  ;;  %57 = vst.msk [vmem:[#allocation4 + $0x20] sm:$0xff] %vm20_vm3, %v3635_v30 }
  0x39   :  { %58 = vst.msk [vmem:[#allocation4 + $0x28] sm:$0xff] %vm20_vm3, %v3635_v30 }
  0x3a   :  { %230 = vmatpush.bf16.xpose.msra.mxu0 %v2534_v9  ;;  %2602 = vmatpush.bf16.xpose.msra.mxu1 %v2534_v9  ;;  %59 = vst.msk [vmem:[#allocation4 + $0x30] sm:$0xff] %vm20_vm3, %v3635_v30 }
  0x3b   :  { %2603 = vmatpush.bf16.xpose.msra.mxu2 %v2534_v9  ;;  %2604 = vmatpush.bf16.xpose.msra.mxu3 %v2534_v9  ;;  %60 = vst.msk [vmem:[#allocation4 + $0x38] sm:$0xff] %vm20_vm3, %v3635_v30 }
  0x3c   :  { %61 = vst.msk [vmem:[#allocation4 + $0x40] sm:$0xff] %vm20_vm3, %v3635_v30  ;;  %v870_v42 = vld [vmem:[#allocation4 + $0x8] sm:$0xff] }
  0x3d   :  { %62 = vst.msk [vmem:[#allocation4 + $0x48] sm:$0xff] %vm20_vm3, %v3635_v30  ;;  %v871_v38 = vld [vmem:[#allocation4 + $0x10] sm:$0xff] }
  0x3e   :  { %63 = vst.msk [vmem:[#allocation4 + $0x50] sm:$0xff] %vm20_vm3, %v3635_v30  ;;  %v872_v57 = vld [vmem:[#allocation4 + $0x18] sm:$0xff] }
  0x3f   :  { %64 = vst.msk [vmem:[#allocation4 + $0x58] sm:$0xff] %vm20_vm3, %v3635_v30  ;;  %v873_v52 = vld [vmem:[#allocation4 + $0x20] sm:$0xff] }
  0x40   :  { %65 = vst.msk [vmem:[#allocation4 + $0x60] sm:$0xff] %vm20_vm3, %v3635_v30  ;;  %v874_v60 = vld [vmem:[#allocation4 + $0x28] sm:$0xff] }
  0x41   :  { %231 = vmatmul.bf16.vlgmr.msra.gmra.mxu0 %v2526_v13  ;;  %241 = vmatmul.bf16.vlgmr.msra.gmra.mxu1 %v2528_v15  ;;  %66 = vst.msk [vmem:[#allocation4 + $0x68] sm:$0xff] %vm20_vm3, %v3635_v30  ;;  %v875_v9 = vld [vmem:[#allocation4 + $0x30] sm:$0xff] }
  0x42   :  { %251 = vmatmul.bf16.vlgmr.msra.gmra.mxu2 %v2530_v21  ;;  %261 = vmatmul.bf16.vlgmr.msra.gmra.mxu3 %v2532_v22  ;;  %67 = vst.msk [vmem:[#allocation4 + $0x70] sm:$0xff] %vm20_vm3, %v3635_v30  ;;  %v876_v2 = vld [vmem:[#allocation4 + $0x38] sm:$0xff] }
  0x43   :  { %68 = vst.msk [vmem:[#allocation4 + $0x78] sm:$0xff] %vm20_vm3, %v3635_v30  ;;  %v877_v21 = vld [vmem:[#allocation4 + $0x40] sm:$0xff] }
  0x44   :  { %2622 = vperm.xlu2 %2620, %v3635_v30   ;;  %69 = vst.msk [vmem:[#allocation5] sm:$0xff] %vm20_vm3, %v3635_v30 }
  0x45   :  { %2616 = vperm.xlu0 %2614, %v3635_v30   ;;  %70 = vst.msk [vmem:[#allocation5 + $0x8] sm:$0xff] %vm20_vm3, %v3635_v30 }
  0x46   :  { %71 = vst.msk [vmem:[#allocation5 + $0x10] sm:$0xff] %vm20_vm3, %v3635_v30 }
  0x47   :  { %72 = vst.msk [vmem:[#allocation5 + $0x18] sm:$0xff] %vm20_vm3, %v3635_v30 }
  0x48   :  { %73 = vst.msk [vmem:[#allocation5 + $0x20] sm:$0xff] %vm20_vm3, %v3635_v30 }
  0x49   :  { %74 = vst.msk [vmem:[#allocation5 + $0x28] sm:$0xff] %vm20_vm3, %v3635_v30 }
  0x4a   :  { %75 = vst.msk [vmem:[#allocation5 + $0x30] sm:$0xff] %vm20_vm3, %v3635_v30 }
  0x4b   :  { %76 = vst.msk [vmem:[#allocation5 + $0x38] sm:$0xff] %vm20_vm3, %v3635_v30 }
  0x4c   :  { %2637 = vperm.xlu2 %2620, %v3635_v30   ;;  %77 = vst.msk [vmem:[#allocation5 + $0x40] sm:$0xff] %vm20_vm3, %v3635_v30 }
  0x4d   :  { %2632 = vperm.xlu0 %2614, %v3635_v30   ;;  %78 = vst.msk [vmem:[#allocation5 + $0x48] sm:$0xff] %vm20_vm3, %v3635_v30 }
  0x4e   :  { %79 = vst.msk [vmem:[#allocation5 + $0x50] sm:$0xff] %vm20_vm3, %v3635_v30 }
  0x4f   :  { %80 = vst.msk [vmem:[#allocation5 + $0x58] sm:$0xff] %vm20_vm3, %v3635_v30 }
  0x50   :  { %81 = vst.msk [vmem:[#allocation5 + $0x60] sm:$0xff] %vm20_vm3, %v3635_v30 }
  0x51   :  { %236 = vmatmul.bf16.gmra.mxu0 %v2527_v23  ;;  %246 = vmatmul.bf16.gmra.mxu1 %v2529_v25  ;;  %82 = vst.msk [vmem:[#allocation5 + $0x68] sm:$0xff] %vm20_vm3, %v3635_v30  ;;  %v879_v25 = vld [vmem:[#allocation4 + $0x50] sm:$0xff] }
  0x52   :  { %256 = vmatmul.bf16.gmra.mxu2 %v2531_v27  ;;  %266 = vmatmul.bf16.gmra.mxu3 %v2533_v28  ;;  %83 = vst.msk [vmem:[#allocation5 + $0x70] sm:$0xff] %vm20_vm3, %v3635_v30 }
  0x53   :  { %2610 = vperm.xlu1 %2608, %v3635_v30   ;;  %84 = vst.msk [vmem:[#allocation5 + $0x78] sm:$0xff] %vm20_vm3, %v3635_v30 }
  0x54   :  { %2657 = vperm.xlu2 %2620, %v3635_v30  }
  0x55   :  { %2652 = vperm.xlu0 %2614, %v3635_v30  }
  0x5b   :  { %2627 = vperm.xlu1 %2608, %v3635_v30  }
  0x63   :  { %2642 = vperm.xlu1 %2608, %v3635_v30  }
  0x6b   :  { %2647 = vperm.xlu1 %2608, %v3635_v30  }
  0x7b   :  { %v886_v35 = vpop.xlane.xlu1 %885 }
  0x7c   :  { %v917_v37 = vadd.f32 %v886_v35, %v869_v33  ;;  %v890_v40 = vpop.xlane.xlu0 %889  ;;  %v878_v33 = vld [vmem:[#allocation4 + $0x48] sm:$0xff] }
  0x7d   :  { %v919_v44 = vadd.f32 %v890_v40, %v871_v38  ;;  %v880_v38 = vld [vmem:[#allocation4 + $0x58] sm:$0xff] }
  0x7e   :  { %933 = vst.msk [vmem:[#allocation4] sm:$0xff] %vm20_vm3, %v917_v37 }
  0x7f   :  { %v888_v48 = vpop.xlane.xlu2 %887  ;;  %935 = vst.msk [vmem:[#allocation4 + $0x10] sm:$0xff] %vm20_vm3, %v919_v44  ;;  %v882_v44 = vld [vmem:[#allocation4 + $0x68] sm:$0xff] }
  0x80   :  { %v918_v51 = vadd.f32 %v888_v48, %v870_v42 }
  0x82   :  { %934 = vst.msk [vmem:[#allocation4 + $0x8] sm:$0xff] %vm20_vm3, %v918_v51 }
  0x83   :  { %v892_v58 = vpop.xlane.xlu1 %891 }
  0x84   :  { %v896_v61 = vpop.xlane.xlu0 %895  ;;  %v920_v62 = vadd.f32 %v892_v58, %v872_v57  ;;  %v883_v57 = vld [vmem:[#allocation4 + $0x70] sm:$0xff] }
  0x85   :  { %v922_v0 = vadd.f32 %v896_v61, %v874_v60 }
  0x86   :  { %936 = vst.msk [vmem:[#allocation4 + $0x18] sm:$0xff] %vm20_vm3, %v920_v62 }
  0x87   :  { %v894_v53 = vpop.xlane.xlu2 %893  ;;  %938 = vst.msk [vmem:[#allocation4 + $0x28] sm:$0xff] %vm20_vm3, %v922_v0 }
  0x88   :  { %v921_v55 = vadd.f32 %v894_v53, %v873_v52  ;;  %v881_v52 = vld [vmem:[#allocation4 + $0x60] sm:$0xff] }
  0x8a   :  { %937 = vst.msk [vmem:[#allocation4 + $0x20] sm:$0xff] %vm20_vm3, %v921_v55 }
  0x8b   :  { %v898_v13 = vpop.xlane.xlu1 %897 }
  0x8c   :  { %v923_v15 = vadd.f32 %v898_v13, %v875_v9  ;;  %v902_v22 = vpop.xlane.xlu0 %901 }
  0x8d   :  { %v925_v23 = vadd.f32 %v902_v22, %v877_v21 }
  0x8e   :  { %939 = vst.msk [vmem:[#allocation4 + $0x30] sm:$0xff] %vm20_vm3, %v923_v15 }
  0x8f   :  { %v900_v3 = vpop.xlane.xlu2 %899  ;;  %941 = vst.msk [vmem:[#allocation4 + $0x40] sm:$0xff] %vm20_vm3, %v925_v23 }
  0x90   :  { %v924_v4 = vadd.f32 %v900_v3, %v876_v2  ;;  %v884_v2 = vld [vmem:[#allocation4 + $0x78] sm:$0xff] }
  0x92   :  { %940 = vst.msk [vmem:[#allocation4 + $0x38] sm:$0xff] %vm20_vm3, %v924_v4 }
  0x93   :  { %v904_v35 = vpop.xlane.xlu1 %903 }
  0x94   :  { %v926_v37 = vadd.f32 %v904_v35, %v878_v33  ;;  %v908_v40 = vpop.xlane.xlu0 %907 }
  0x95   :  { %v928_v42 = vadd.f32 %v908_v40, %v880_v38 }
  0x96   :  { %942 = vst.msk [vmem:[#allocation4 + $0x48] sm:$0xff] %vm20_vm3, %v926_v37 }
  0x97   :  { %v906_v27 = vpop.xlane.xlu2 %905  ;;  %944 = vst.msk [vmem:[#allocation4 + $0x58] sm:$0xff] %vm20_vm3, %v928_v42 }
  0x98   :  { %v927_v28 = vadd.f32 %v906_v27, %v879_v25 }
  0x9a   :  { %943 = vst.msk [vmem:[#allocation4 + $0x50] sm:$0xff] %vm20_vm3, %v927_v28 }
  0x9b   :  { %v910_v53 = vpop.xlane.xlu1 %909 }
  0x9c   :  { %v929_v55 = vadd.f32 %v910_v53, %v881_v52  ;;  %v914_v58 = vpop.xlane.xlu0 %913 }
  0x9d   :  { %v931_v60 = vadd.f32 %v914_v58, %v883_v57 }
  0x9e   :  { %945 = vst.msk [vmem:[#allocation4 + $0x60] sm:$0xff] %vm20_vm3, %v929_v55 }
  0x9f   :  { %v912_v48 = vpop.xlane.xlu2 %911  ;;  %947 = vst.msk [vmem:[#allocation4 + $0x70] sm:$0xff] %vm20_vm3, %v931_v60 }
  0xa0   :  { %v930_v51 = vadd.f32 %v912_v48, %v882_v44 }
  0xa2   :  { %946 = vst.msk [vmem:[#allocation4 + $0x68] sm:$0xff] %vm20_vm3, %v930_v51 }
  0xa3   :  { %v916_v15 = vpop.xlane.xlu1 %915 }
  0xa4   :  { %v932_v21 = vadd.f32 %v916_v15, %v884_v2  ;;  %v3190_v25 = vpop.xlane.xlu0 %1810 }
  0xa6   :  { %948 = vst.msk [vmem:[#allocation4 + $0x78] sm:$0xff] %vm20_vm3, %v932_v21 }
  0xa7   :  { %v2623_v61 = vpop.permute.xlu2 %2622 }
  0xa8   :  { %v2625_v62 = vunpack.i.h.bf16 %v2623_v61  ;;  %v2624_v0 = vunpack.i.l.bf16 %v2623_v61 }
  0xaa   :  { %2345 = vst [vmem:[%s3627_s3 + $0x38] sm:$0xff] %v2625_v62 }
  0xab   :  { %2344 = vst [vmem:[%s3627_s3 + $0x30] sm:$0xff] %v2624_v0  ;;  %v3202_v42 = vpop.xlane.xlu1 %1812 }
  0xaf   :  { %v2638_v27 = vpop.permute.xlu2 %2637 }
  0xb0   :  { %v2640_v28 = vunpack.i.h.bf16 %v2638_v27  ;;  %v2639_v33 = vunpack.i.l.bf16 %v2638_v27 }
  0xb2   :  { %2351 = vst [vmem:[%s3627_s3 + $0x68] sm:$0xff] %v2640_v28 }
  0xb3   :  { %2350 = vst [vmem:[%s3627_s3 + $0x60] sm:$0xff] %v2639_v33 }
  0xb7   :  { %v2617_v53 = vpop.permute.xlu0 %2616 }
  0xb8   :  { %v2619_v57 = vunpack.i.h.bf16 %v2617_v53  ;;  %v2618_v58 = vunpack.i.l.bf16 %v2617_v53 }
  0xba   :  { %2343 = vst [vmem:[%s3627_s3 + $0x28] sm:$0xff] %v2619_v57 }
  0xbb   :  { %2342 = vst [vmem:[%s3627_s3 + $0x20] sm:$0xff] %v2618_v58 }
  0xbe   :  { %v232_v3 = vpop.f32.mrf.mxu0  ;;  %v242_v4 = vpop.f32.mrf.mxu1 }
  0xbf   :  { %v3176_v9 = vmul.f32 14.285714, %v232_v3  ;;  %v3178_v13 = vmul.f32 14.285714, %v242_v4  ;;  %v2633_v21 = vpop.permute.xlu0 %2632 }
  0xc1   :  { %v392_v22 = vsel %vm371_vm14, %v3178_v13, -inf  ;;  %v388_v23 = vsel %vm371_vm14, %v3176_v9, -inf  ;;  %v969_v40 = vmul.f32 %v2913_v41, %v3178_v13  ;;  %v965_v48 = vmul.f32 %v2803_v8, %v3176_v9  ;;  %v2658_v41 = vpop.permute.xlu2 %2657 }
  0xc2   :  { %492 = vmax.xlane.f32.xlu2 %v392_v22  ;;  %484 = vmax.xlane.f32.xlu0 %v388_v23  ;;  %v2660_v60 = vunpack.i.h.bf16 %v2658_v41  ;;  %v2659_v61 = vunpack.i.l.bf16 %v2658_v41  ;;  %v2635_v22 = vunpack.i.h.bf16 %v2633_v21  ;;  %v2634_v23 = vunpack.i.l.bf16 %v2633_v21 }
  0xc4   :  { %2441 = vst [vmem:[%s3628_s4 + $0x38] sm:$0xff] %v2660_v60 }
  0xc5   :  { %v252_v35 = vpop.f32.mrf.mxu2  ;;  %v262_v38 = vpop.f32.mrf.mxu3  ;;  %2440 = vst [vmem:[%s3628_s4 + $0x30] sm:$0xff] %v2659_v61 }
  0xc6   :  { %v3192_v37 = vmul.f32 14.285714, %v252_v35  ;;  %v244_v51 = vpop.f32.mrf.mxu1  ;;  %v3208_v52 = vmul.f32 14.285714, %v262_v38  ;;  %v2611_v3 = vpop.permute.xlu1 %2610  ;;  %2349 = vst [vmem:[%s3627_s3 + $0x58] sm:$0xff] %v2635_v22 }
  0xc7   :  { %v3210_v55 = vmul.f32 14.285714, %v244_v51  ;;  %v2613_v4 = vunpack.i.h.bf16 %v2611_v3  ;;  %v2612_v15 = vunpack.i.l.bf16 %v2611_v3  ;;  %2348 = vst [vmem:[%s3627_s3 + $0x50] sm:$0xff] %v2634_v23  ;;  %v2653_v51 = vpop.permute.xlu0 %2652 }
  0xc8   :  { %v973_v44 = vmul.f32 %v2932_v46, %v3192_v37  ;;  %v396_v8 = vsel %vm371_vm14, %v3192_v37, -inf  ;;  %v234_v46 = vpop.f32.mrf.mxu0  ;;  %v400_v0 = vsel %vm371_vm14, %v3208_v52, -inf  ;;  %v977_v28 = vmul.f32 %v2987_v63, %v3208_v52 }
  0xc9   :  { %v970_v62 = vmul.f32 %v2876_v32, %v3210_v55  ;;  %2341 = vst [vmem:[%s3627_s3 + $0x18] sm:$0xff] %v2613_v4  ;;  %v3240_v27 = vmul.f32 14.285714, %v234_v46  ;;  %v2655_v53 = vunpack.i.h.bf16 %v2653_v51  ;;  %v2654_v41 = vunpack.i.l.bf16 %v2653_v51 }
  0xca   :  { %997 = vadd.xlane.f32.xlu1 %v973_v44  ;;  %981 = vadd.xlane.f32.xlu2 %v965_v48  ;;  %2340 = vst [vmem:[%s3627_s3 + $0x10] sm:$0xff] %v2612_v15  ;;  %v393_v60 = vsel %vm371_vm14, %v3210_v55, -inf }
  0xcb   :  { %989 = vadd.xlane.f32.xlu0 %v969_v40  ;;  %v389_v63 = vsel %vm371_vm14, %v3240_v27, -inf  ;;  %2439 = vst [vmem:[%s3628_s4 + $0x28] sm:$0xff] %v2655_v53  ;;  %v966_v61 = vmul.f32 %v2845_v20, %v3240_v27 }
  0xcc   :  { %2438 = vst [vmem:[%s3628_s4 + $0x20] sm:$0xff] %v2654_v41 }
  0xcd   :  { %v264_v2 = vpop.f32.mrf.mxu3  ;;  %v254_v58 = vpop.f32.mrf.mxu2 }
  0xce   :  { %v3232_v32 = vmul.f32 14.285714, %v264_v2  ;;  %v2628_v38 = vpop.permute.xlu1 %2627  ;;  %v247_v20 = vpop.f32.mrf.mxu1 }
  0xcf   :  { %v2630_v40 = vunpack.i.h.bf16 %v2628_v38  ;;  %v2629_v44 = vunpack.i.l.bf16 %v2628_v38  ;;  %v3293_v22 = vmul.f32 14.285714, %v247_v20 }
  0xd0   :  { %v401_v33 = vsel %vm371_vm14, %v3232_v32, -inf  ;;  %v237_v35 = vpop.f32.mrf.mxu0  ;;  %v978_v38 = vmul.f32 %v3029_v19, %v3232_v32 }
  0xd1   :  { %v3256_v48 = vmul.f32 14.285714, %v237_v35  ;;  %2347 = vst [vmem:[%s3627_s3 + $0x48] sm:$0xff] %v2630_v40  ;;  %v2756_v40 = vmov -inf   ;;  %v394_v19 = vsel %vm371_vm14, %v3293_v22, -inf }
  0xd2   :  { %991 = vadd.xlane.f32.xlu1 %v970_v62  ;;  %500 = vmax.xlane.f32.xlu2 %v396_v8  ;;  %2346 = vst [vmem:[%s3627_s3 + $0x40] sm:$0xff] %v2629_v44 }
  0xd3   :  { %508 = vmax.xlane.f32.xlu0 %v400_v0  ;;  %v390_v57 = vsel %vm371_vm14, %v3256_v48, -inf  ;;  %v3278_v0 = vmul.f32 14.285714, %v254_v58  ;;  %v967_v2 = vmul.f32 %v2828_v17, %v3256_v48  ;;  %v971_v17 = vmul.f32 %v2885_v36, %v3293_v22  ;;  %25 = vst.msk [vmem:[#allocation2 + $0x20] sm:$0xff] %vm20_vm3, %v2756_v40 }
  0xd4   :  { %21 = vst.msk [vmem:[#allocation2] sm:$0xff] %vm20_vm3, %v2756_v40 }
  0xd5   :  { %v974_v3 = vmul.f32 %v2937_v47, %v3278_v0  ;;  %v257_v4 = vpop.f32.mrf.mxu2  ;;  %v397_v21 = vsel %vm371_vm14, %v3278_v0, -inf  ;;  %v267_v35 = vpop.f32.mrf.mxu3  ;;  %22 = vst.msk [vmem:[#allocation2 + $0x8] sm:$0xff] %vm20_vm3, %v2756_v40 }
  0xd6   :  { %v2643_v8 = vpop.permute.xlu1 %2642  ;;  %23 = vst.msk [vmem:[#allocation2 + $0x10] sm:$0xff] %vm20_vm3, %v2756_v40 }
  0xd7   :  { %v2645_v46 = vunpack.i.h.bf16 %v2643_v8  ;;  %v2644_v62 = vunpack.i.l.bf16 %v2643_v8  ;;  %24 = vst.msk [vmem:[#allocation2 + $0x18] sm:$0xff] %vm20_vm3, %v2756_v40 }
  0xd8   :  { %v239_v51 = vpop.f32.mrf.mxu0  ;;  %26 = vst.msk [vmem:[#allocation2 + $0x28] sm:$0xff] %vm20_vm3, %v2756_v40 }
  0xd9   :  { %2353 = vst [vmem:[%s3627_s3 + $0x78] sm:$0xff] %v2645_v46 }
  0xda   :  { %510 = vmax.xlane.f32.xlu1 %v401_v33  ;;  %1005 = vadd.xlane.f32.xlu2 %v977_v28  ;;  %2352 = vst [vmem:[%s3627_s3 + $0x70] sm:$0xff] %v2644_v62  ;;  %v3295_v33 = vmul.f32 14.285714, %v257_v4 }
  0xdb   :  { %486 = vmax.xlane.f32.xlu0 %v389_v63  ;;  %v3310_v63 = vmul.f32 14.285714, %v267_v35  ;;  %27 = vst.msk [vmem:[#allocation2 + $0x30] sm:$0xff] %vm20_vm3, %v2756_v40 }
  0xdc   :  { %v398_v47 = vsel %vm371_vm14, %v3295_v33, -inf  ;;  %28 = vst.msk [vmem:[#allocation2 + $0x38] sm:$0xff] %vm20_vm3, %v2756_v40 }
  0xdd   :  { %v979_v36 = vmul.f32 %v3015_v10, %v3310_v63  ;;  %v402_v44 = vsel %vm371_vm14, %v3310_v63, -inf  ;;  %v3328_v10 = vmul.f32 14.285714, %v239_v51  ;;  %29 = vst.msk [vmem:[#allocation2 + $0x40] sm:$0xff] %vm20_vm3, %v2756_v40  ;;  %v259_v58 = vpop.f32.mrf.mxu2  ;;  %v269_v8 = vpop.f32.mrf.mxu3 }
  0xde   :  { %v2648_v15 = vpop.permute.xlu1 %2647  ;;  %30 = vst.msk [vmem:[#allocation2 + $0x48] sm:$0xff] %vm20_vm3, %v2756_v40 }
  0xdf   :  { %v2650_v23 = vunpack.i.h.bf16 %v2648_v15  ;;  %v2649_v28 = vunpack.i.l.bf16 %v2648_v15  ;;  %31 = vst.msk [vmem:[#allocation2 + $0x50] sm:$0xff] %vm20_vm3, %v2756_v40  ;;  %v968_v53 = vmul.f32 %v2834_v18, %v3328_v10  ;;  %v391_v41 = vsel %vm371_vm14, %v3328_v10, -inf  ;;  %v520_v15 = vld [vmem:[#allocation2 + $0x20] sm:$0xff] }
  0xe0   :  { %32 = vst.msk [vmem:[#allocation2 + $0x58] sm:$0xff] %vm20_vm3, %v2756_v40  ;;  %v3345_v18 = vmul.f32 14.285714, %v259_v58  ;;  %vm552_vm8 = vcmp.eq.f32.partialorder %v520_v15, -inf }
  0xe1   :  { %2437 = vst [vmem:[%s3628_s4 + $0x18] sm:$0xff] %v2650_v23 }
  0xe2   :  { %488 = vmax.xlane.f32.xlu1 %v390_v57  ;;  %494 = vmax.xlane.f32.xlu2 %v393_v60  ;;  %2436 = vst [vmem:[%s3628_s4 + $0x10] sm:$0xff] %v2649_v28  ;;  %v975_v57 = vmul.f32 %v2998_v5, %v3295_v33  ;;  %v249_v60 = vpop.f32.mrf.mxu1  ;;  %v399_v46 = vsel %vm371_vm14, %v3345_v18, -inf  ;;  %v976_v20 = vmul.f32 %v2978_v59, %v3345_v18 }
  0xe3   :  { %983 = vadd.xlane.f32.xlu0 %v966_v61  ;;  %33 = vst.msk [vmem:[#allocation2 + $0x60] sm:$0xff] %vm20_vm3, %v2756_v40  ;;  %v3347_v61 = vmul.f32 14.285714, %v249_v60 }
  0xe4   :  { %34 = vst.msk [vmem:[#allocation2 + $0x68] sm:$0xff] %vm20_vm3, %v2756_v40 }
  0xe5   :  { %35 = vst.msk [vmem:[#allocation2 + $0x70] sm:$0xff] %vm20_vm3, %v2756_v40  ;;  %v395_v5 = vsel %vm371_vm14, %v3347_v61, -inf  ;;  %v972_v62 = vmul.f32 %v2946_v50, %v3347_v61  ;;  %v516_v50 = vld [vmem:[#allocation2] sm:$0xff] }
  0xe6   :  { %36 = vst.msk [vmem:[#allocation2 + $0x78] sm:$0xff] %vm20_vm3, %v2756_v40  ;;  %v949_v40 = vld [vmem:[#allocation5] sm:$0xff]  ;;  %vm548_vm2 = vcmp.eq.f32.partialorder %v516_v50, -inf }
  0xea   :  { %985 = vadd.xlane.f32.xlu1 %v967_v2  ;;  %999 = vadd.xlane.f32.xlu2 %v974_v3  ;;  %v3357_v2 = vmul.f32 14.285714, %v269_v8  ;;  %v954_v8 = vld [vmem:[#allocation5 + $0x28] sm:$0xff] }
  0xeb   :  { %502 = vmax.xlane.f32.xlu0 %v397_v21 }
  0xec   :  { %v980_v3 = vmul.f32 %v3020_v11, %v3357_v2  ;;  %v403_v4 = vsel %vm371_vm14, %v3357_v2, -inf }
  0xf2   :  { %504 = vmax.xlane.f32.xlu1 %v398_v47  ;;  %993 = vadd.xlane.f32.xlu2 %v971_v17 }
  0xf3   :  { %1007 = vadd.xlane.f32.xlu0 %v978_v38  ;;  %v957_v38 = vld [vmem:[#allocation5 + $0x40] sm:$0xff] }
  0xfa   :  { %1009 = vadd.xlane.f32.xlu1 %v979_v36  ;;  %512 = vmax.xlane.f32.xlu2 %v402_v44  ;;  %v953_v36 = vld [vmem:[#allocation5 + $0x20] sm:$0xff] }
  0xfb   :  { %496 = vmax.xlane.f32.xlu0 %v394_v19 }
 0x102   :  { %490 = vmax.xlane.f32.xlu1 %v391_v41  ;;  %987 = vadd.xlane.f32.xlu2 %v968_v53 }
 0x103   :  { %1001 = vadd.xlane.f32.xlu0 %v975_v57 }
 0x10a   :  { %498 = vmax.xlane.f32.xlu1 %v395_v5  ;;  %506 = vmax.xlane.f32.xlu2 %v399_v46  ;;  %v524_v5 = vld [vmem:[#allocation2 + $0x40] sm:$0xff] }
 0x10b   :  { %995 = vadd.xlane.f32.xlu0 %v972_v62  ;;  %v528_v62 = vld [vmem:[#allocation2 + $0x60] sm:$0xff]  ;;  %vm556_vm6 = vcmp.eq.f32.partialorder %v524_v5, -inf }
 0x10c   :  { %vm560_vm13 = vcmp.eq.f32.partialorder %v528_v62, -inf }
 0x112   :  { %1003 = vadd.xlane.f32.xlu1 %v976_v20  ;;  %1011 = vadd.xlane.f32.xlu2 %v980_v3 }
 0x113   :  { %514 = vmax.xlane.f32.xlu0 %v403_v4 }
 0x135   :  { %v493_v21 = vpop.xlane.xlu2 %492  ;;  %v485_v23 = vpop.xlane.xlu0 %484 }
 0x136   :  { %v536_v28 = vmax.f32 %v520_v15, %v493_v21  ;;  %v532_v17 = vmax.f32 %v516_v50, %v485_v23 }
 0x138   :  { %v568_v47 = vsub.f32 %v520_v15, %v536_v28  ;;  %857 = vst.msk [vmem:[#allocation2 + $0x20] sm:$0xff] %vm20_vm3, %v536_v28  ;;  %v564_v59 = vsub.f32 %v516_v50, %v532_v17  ;;  %630 = vperm.xlu1 %2608, %v532_v17  }
 0x139   :  { %853 = vst.msk [vmem:[#allocation2] sm:$0xff] %vm20_vm3, %v532_v17 }
 0x13a   :  { %v588_v11 = vmul.f32 1.442695, %v568_v47  ;;  %v580_v35 = vmul.f32 1.442695, %v564_v59 }
 0x13c   :  { %2682 = vpow2.f32 %v588_v11  ;;  %v529_v11 = vld [vmem:[#allocation2 + $0x68] sm:$0xff] }
 0x13d   :  { %2684 = vpow2.f32 %v580_v35  ;;  %v998_v44 = vpop.xlane.xlu1 %997  ;;  %v982_v19 = vpop.xlane.xlu2 %981  ;;  %v961_v35 = vld [vmem:[#allocation5 + $0x60] sm:$0xff] }
 0x13e   :  { %v1021_v51 = vadd.f32 %v998_v44, %v957_v38  ;;  %v1013_v53 = vadd.f32 %v982_v19, %v949_v40  ;;  %v990_v41 = vpop.xlane.xlu0 %989  ;;  %v517_v38 = vld [vmem:[#allocation2 + $0x8] sm:$0xff] }
 0x13f   :  { %v1017_v57 = vadd.f32 %v990_v41, %v953_v36 }
 0x140   :  { %1037 = vst.msk [vmem:[#allocation5 + $0x40] sm:$0xff] %vm20_vm3, %v1021_v51  ;;  %650 = vperm.xlu1 %2608, %v536_v28  }
 0x141   :  { %1029 = vst.msk [vmem:[#allocation5] sm:$0xff] %vm20_vm3, %v1013_v53 }
 0x142   :  { %v2683_v58 = vpop.eup %2682  ;;  %1033 = vst.msk [vmem:[#allocation5 + $0x20] sm:$0xff] %vm20_vm3, %v1017_v57 }
 0x143   :  { %v2685_v60 = vpop.eup %2684  ;;  %v3371_v46 = vsel %vm552_vm8, 0.0, %v2683_v58  ;;  %vm561_vm8 = vcmp.eq.f32.partialorder %v529_v11, -inf }
 0x144   :  { %v3373_v20 = vsel %vm548_vm2, 0.0, %v2685_v60  ;;  %vm549_vm2 = vcmp.eq.f32.partialorder %v517_v38, -inf }
 0x145   :  { %v992_v3 = vpop.xlane.xlu1 %991  ;;  %v501_v4 = vpop.xlane.xlu2 %500 }
 0x146   :  { %v1018_v21 = vadd.f32 %v992_v3, %v954_v8  ;;  %v540_v23 = vmax.f32 %v524_v5, %v501_v4  ;;  %v509_v28 = vpop.xlane.xlu0 %508  ;;  %v518_v4 = vld [vmem:[#allocation2 + $0x10] sm:$0xff] }
 0x147   :  { %v544_v15 = vmax.f32 %v528_v62, %v509_v28  ;;  %v950_v28 = vld [vmem:[#allocation5 + $0x8] sm:$0xff] }
 0x148   :  { %1034 = vst.msk [vmem:[#allocation5 + $0x28] sm:$0xff] %vm20_vm3, %v1018_v21  ;;  %v572_v50 = vsub.f32 %v524_v5, %v540_v23  ;;  %670 = vperm.xlu1 %2608, %v540_v23   ;;  %v521_v21 = vld [vmem:[#allocation2 + $0x28] sm:$0xff] }
 0x149   :  { %861 = vst.msk [vmem:[#allocation2 + $0x40] sm:$0xff] %vm20_vm3, %v540_v23  ;;  %v576_v17 = vsub.f32 %v528_v62, %v544_v15  ;;  %690 = vperm.xlu0 %2614, %v544_v15  }
 0x14a   :  { %v596_v47 = vmul.f32 1.442695, %v572_v50  ;;  %865 = vst.msk [vmem:[#allocation2 + $0x60] sm:$0xff] %vm20_vm3, %v544_v15 }
 0x14b   :  { %v604_v59 = vmul.f32 1.442695, %v576_v17 }
 0x14c   :  { %2686 = vpow2.f32 %v596_v47 }
 0x14d   :  { %2688 = vpow2.f32 %v604_v59  ;;  %v511_v40 = vpop.xlane.xlu1 %510  ;;  %v1006_v36 = vpop.xlane.xlu2 %1005 }
 0x14e   :  { %v545_v44 = vmax.f32 %v529_v11, %v511_v40  ;;  %v1025_v19 = vadd.f32 %v1006_v36, %v961_v35  ;;  %v487_v51 = vpop.xlane.xlu0 %486 }
 0x14f   :  { %v533_v53 = vmax.f32 %v517_v38, %v487_v51 }
 0x150   :  { %v577_v41 = vsub.f32 %v529_v11, %v545_v44  ;;  %866 = vst.msk [vmem:[#allocation2 + $0x68] sm:$0xff] %vm20_vm3, %v545_v44 }
 0x151   :  { %1041 = vst.msk [vmem:[#allocation5 + $0x60] sm:$0xff] %vm20_vm3, %v1025_v19  ;;  %v565_v57 = vsub.f32 %v517_v38, %v533_v53  ;;  %635 = vperm.xlu2 %2620, %v533_v53  }
 0x152   :  { %v2687_v58 = vpop.eup %2686  ;;  %v606_v60 = vmul.f32 1.442695, %v577_v41  ;;  %854 = vst.msk [vmem:[#allocation2 + $0x8] sm:$0xff] %vm20_vm3, %v533_v53  ;;  %v951_v41 = vld [vmem:[#allocation5 + $0x10] sm:$0xff] }
 0x153   :  { %v2689_v8 = vpop.eup %2688  ;;  %v582_v3 = vmul.f32 1.442695, %v565_v57  ;;  %v3381_v23 = vsel %vm556_vm6, 0.0, %v2687_v58  ;;  %v958_v57 = vld [vmem:[#allocation5 + $0x48] sm:$0xff]  ;;  %vm550_vm6 = vcmp.eq.f32.partialorder %v518_v4, -inf }
 0x154   :  { %2690 = vpow2.f32 %v606_v60  ;;  %v3383_v15 = vsel %vm560_vm13, 0.0, %v2689_v8  ;;  %v525_v60 = vld [vmem:[#allocation2 + $0x48] sm:$0xff]  ;;  %vm553_vm13 = vcmp.eq.f32.partialorder %v521_v21, -inf }
 0x155   :  { %2692 = vpow2.f32 %v582_v3  ;;  %v489_v5 = vpop.xlane.xlu1 %488  ;;  %v495_v50 = vpop.xlane.xlu2 %494 }
 0x156   :  { %v534_v17 = vmax.f32 %v518_v4, %v489_v5  ;;  %v537_v47 = vmax.f32 %v521_v21, %v495_v50  ;;  %v984_v62 = vpop.xlane.xlu0 %983 }
 0x157   :  { %v1014_v59 = vadd.f32 %v984_v62, %v950_v28 }
 0x158   :  { %v566_v35 = vsub.f32 %v518_v4, %v534_v17  ;;  %855 = vst.msk [vmem:[#allocation2 + $0x10] sm:$0xff] %vm20_vm3, %v534_v17  ;;  %v569_v40 = vsub.f32 %v521_v21, %v537_v47 }
 0x159   :  { %858 = vst.msk [vmem:[#allocation2 + $0x28] sm:$0xff] %vm20_vm3, %v537_v47  ;;  %655 = vperm.xlu2 %2620, %v537_v47  }
 0x15a   :  { %v2691_v36 = vpop.eup %2690  ;;  %v584_v19 = vmul.f32 1.442695, %v566_v35  ;;  %v590_v51 = vmul.f32 1.442695, %v569_v40  ;;  %1030 = vst.msk [vmem:[#allocation5 + $0x8] sm:$0xff] %vm20_vm3, %v1014_v59  ;;  %v526_v40 = vld [vmem:[#allocation2 + $0x50] sm:$0xff] }
 0x15b   :  { %v2693_v53 = vpop.eup %2692  ;;  %v3388_v58 = vsel %vm561_vm8, 0.0, %v2691_v36  ;;  %v955_v36 = vld [vmem:[#allocation5 + $0x30] sm:$0xff]  ;;  %vm557_vm8 = vcmp.eq.f32.partialorder %v525_v60, -inf }
 0x15c   :  { %3639 = vst [vmem:[#allocation6_spill] sm:$0xff] %v3388_v58  ;;  %2694 = vpow2.f32 %v584_v19  ;;  %v3390_v8 = vsel %vm549_vm2, 0.0, %v2693_v53  ;;  %vm558_vm2 = vcmp.eq.f32.partialorder %v526_v40, -inf }
 0x15d   :  { %2696 = vpow2.f32 %v590_v51  ;;  %v986_v11 = vpop.xlane.xlu1 %985  ;;  %v1000_v3 = vpop.xlane.xlu2 %999  ;;  %v962_v51 = vld [vmem:[#allocation5 + $0x68] sm:$0xff] }
 0x15e   :  { %v1015_v28 = vadd.f32 %v986_v11, %v951_v41  ;;  %v1022_v5 = vadd.f32 %v1000_v3, %v958_v57  ;;  %v503_v38 = vpop.xlane.xlu0 %502 }
 0x15f   :  { %v541_v50 = vmax.f32 %v525_v60, %v503_v38  ;;  %v963_v38 = vld [vmem:[#allocation5 + $0x70] sm:$0xff] }
 0x160   :  { %1031 = vst.msk [vmem:[#allocation5 + $0x10] sm:$0xff] %vm20_vm3, %v1015_v28 }
 0x161   :  { %1038 = vst.msk [vmem:[#allocation5 + $0x48] sm:$0xff] %vm20_vm3, %v1022_v5  ;;  %v573_v47 = vsub.f32 %v525_v60, %v541_v50  ;;  %695 = vperm.xlu2 %2620, %v545_v44   ;;  %675 = vperm.xlu0 %2614, %v541_v50  }
 0x162   :  { %v2695_v62 = vpop.eup %2694  ;;  %862 = vst.msk [vmem:[#allocation2 + $0x48] sm:$0xff] %vm20_vm3, %v541_v50  ;;  %v530_v50 = vld [vmem:[#allocation2 + $0x70] sm:$0xff] }
 0x163   :  { %v2697_v59 = vpop.eup %2696  ;;  %v598_v35 = vmul.f32 1.442695, %v573_v47  ;;  %v3395_v19 = vsel %vm550_vm6, 0.0, %v2695_v62  ;;  %v522_v47 = vld [vmem:[#allocation2 + $0x30] sm:$0xff]  ;;  %vm562_vm6 = vcmp.eq.f32.partialorder %v530_v50, -inf }
 0x164   :  { %v3397_v53 = vsel %vm553_vm13, 0.0, %v2697_v59  ;;  %vm554_vm13 = vcmp.eq.f32.partialorder %v522_v47, -inf }
 0x165   :  { %2698 = vpow2.f32 %v598_v35  ;;  %v505_v4 = vpop.xlane.xlu1 %504  ;;  %v994_v41 = vpop.xlane.xlu2 %993 }
 0x166   :  { %v542_v57 = vmax.f32 %v526_v40, %v505_v4  ;;  %v1019_v11 = vadd.f32 %v994_v41, %v955_v36  ;;  %v1008_v44 = vpop.xlane.xlu0 %1007 }
 0x167   :  { %v1026_v3 = vadd.f32 %v1008_v44, %v962_v51 }
 0x168   :  { %v574_v21 = vsub.f32 %v526_v40, %v542_v57  ;;  %863 = vst.msk [vmem:[#allocation2 + $0x50] sm:$0xff] %vm20_vm3, %v542_v57 }
 0x169   :  { %1035 = vst.msk [vmem:[#allocation5 + $0x30] sm:$0xff] %vm20_vm3, %v1019_v11  ;;  %680 = vperm.xlu2 %2620, %v542_v57   ;;  %640 = vperm.xlu0 %2614, %v534_v17  }
 0x16a   :  { %v600_v28 = vmul.f32 1.442695, %v574_v21  ;;  %1042 = vst.msk [vmem:[#allocation5 + $0x68] sm:$0xff] %vm20_vm3, %v1026_v3  ;;  %v519_v3 = vld [vmem:[#allocation2 + $0x18] sm:$0xff] }
 0x16b   :  { %v2699_v5 = vpop.eup %2698  ;;  %v952_v21 = vld [vmem:[#allocation5 + $0x18] sm:$0xff] }
 0x16c   :  { %2700 = vpow2.f32 %v600_v28  ;;  %v3402_v62 = vsel %vm557_vm8, 0.0, %v2699_v5  ;;  %v959_v5 = vld [vmem:[#allocation5 + $0x50] sm:$0xff]  ;;  %vm551_vm8 = vcmp.eq.f32.partialorder %v519_v3, -inf }
 0x16d   :  { %v1010_v59 = vpop.xlane.xlu1 %1009  ;;  %v513_v35 = vpop.xlane.xlu2 %512 }
 0x16e   :  { %v1027_v36 = vadd.f32 %v1010_v59, %v963_v38  ;;  %v546_v51 = vmax.f32 %v530_v50, %v513_v35  ;;  %v497_v4 = vpop.xlane.xlu0 %496 }
 0x16f   :  { %v538_v41 = vmax.f32 %v522_v47, %v497_v4 }
 0x170   :  { %1043 = vst.msk [vmem:[#allocation5 + $0x70] sm:$0xff] %vm20_vm3, %v1027_v36  ;;  %v578_v17 = vsub.f32 %v530_v50, %v546_v51 }
 0x171   :  { %867 = vst.msk [vmem:[#allocation2 + $0x70] sm:$0xff] %vm20_vm3, %v546_v51  ;;  %v570_v60 = vsub.f32 %v522_v47, %v538_v41  ;;  %660 = vperm.xlu1 %2608, %v538_v41  }
 0x172   :  { %v2701_v57 = vpop.eup %2700  ;;  %v608_v11 = vmul.f32 1.442695, %v578_v17  ;;  %859 = vst.msk [vmem:[#allocation2 + $0x30] sm:$0xff] %vm20_vm3, %v538_v41 }
 0x173   :  { %v592_v44 = vmul.f32 1.442695, %v570_v60  ;;  %v3407_v28 = vsel %vm558_vm2, 0.0, %v2701_v57  ;;  %v523_v57 = vld [vmem:[#allocation2 + $0x38] sm:$0xff] }
 0x174   :  { %3640 = vst [vmem:[#allocation7_spill] sm:$0xff] %v3407_v28  ;;  %2702 = vpow2.f32 %v608_v11  ;;  %v527_v11 = vld [vmem:[#allocation2 + $0x58] sm:$0xff]  ;;  %vm555_vm2 = vcmp.eq.f32.partialorder %v523_v57, -inf }
 0x175   :  { %2704 = vpow2.f32 %v592_v44  ;;  %v491_v38 = vpop.xlane.xlu1 %490  ;;  %v988_v59 = vpop.xlane.xlu2 %987 }
 0x176   :  { %v535_v35 = vmax.f32 %v519_v3, %v491_v38  ;;  %v1016_v40 = vadd.f32 %v988_v59, %v952_v21  ;;  %v1002_v36 = vpop.xlane.xlu0 %1001  ;;  %v956_v21 = vld [vmem:[#allocation5 + $0x38] sm:$0xff] }
 0x177   :  { %v1023_v4 = vadd.f32 %v1002_v36, %v959_v5 }
 0x178   :  { %v567_v30 = vsub.f32 %v519_v3, %v535_v35  ;;  %856 = vst.msk [vmem:[#allocation2 + $0x18] sm:$0xff] %vm20_vm3, %v535_v35  ;;  %645 = vperm.xlu2 %2620, %v535_v35  }
 0x179   :  { %1032 = vst.msk [vmem:[#allocation5 + $0x18] sm:$0xff] %vm20_vm3, %v1016_v40  ;;  %700 = vperm.xlu1 %2608, %v546_v51  }
 0x17a   :  { %v2703_v41 = vpop.eup %2702  ;;  %v586_v17 = vmul.f32 1.442695, %v567_v30  ;;  %1039 = vst.msk [vmem:[#allocation5 + $0x50] sm:$0xff] %vm20_vm3, %v1023_v4 }
 0x17b   :  { %v2705_v60 = vpop.eup %2704  ;;  %v3412_v44 = vsel %vm562_vm6, 0.0, %v2703_v41  ;;  %vm559_vm6 = vcmp.eq.f32.partialorder %v527_v11, -inf }
 0x17c   :  { %2706 = vpow2.f32 %v586_v17  ;;  %v3414_v5 = vsel %vm554_vm13, 0.0, %v2705_v60  ;;  %v960_v17 = vld [vmem:[#allocation5 + $0x58] sm:$0xff] }
 0x17d   :  { %v499_v38 = vpop.xlane.xlu1 %498  ;;  %v507_v59 = vpop.xlane.xlu2 %506  ;;  %v964_v60 = vld [vmem:[#allocation5 + $0x78] sm:$0xff] }
 0x17e   :  { %v539_v50 = vmax.f32 %v523_v57, %v499_v38  ;;  %v543_v35 = vmax.f32 %v527_v11, %v507_v59  ;;  %v996_v40 = vpop.xlane.xlu0 %995 }
 0x17f   :  { %v1020_v51 = vadd.f32 %v996_v40, %v956_v21  ;;  %v531_v21 = vld [vmem:[#allocation2 + $0x78] sm:$0xff] }
 0x180   :  { %v571_v47 = vsub.f32 %v523_v57, %v539_v50  ;;  %860 = vst.msk [vmem:[#allocation2 + $0x38] sm:$0xff] %vm20_vm3, %v539_v50  ;;  %v575_v30 = vsub.f32 %v527_v11, %v543_v35  ;;  %665 = vperm.xlu2 %2620, %v539_v50   ;;  %vm563_vm13 = vcmp.eq.f32.partialorder %v531_v21, -inf }
 0x181   :  { %864 = vst.msk [vmem:[#allocation2 + $0x58] sm:$0xff] %vm20_vm3, %v543_v35  ;;  %685 = vperm.xlu1 %2608, %v543_v35  }
 0x182   :  { %v2707_v36 = vpop.eup %2706  ;;  %v594_v4 = vmul.f32 1.442695, %v571_v47  ;;  %v602_v41 = vmul.f32 1.442695, %v575_v30  ;;  %1036 = vst.msk [vmem:[#allocation5 + $0x38] sm:$0xff] %vm20_vm3, %v1020_v51 }
 0x183   :  { %v3419_v38 = vsel %vm551_vm8, 0.0, %v2707_v36  ;;  %vm404_vm8 = vmand %vm371_vm14, %vm372_vm0 }
 0x184   :  { %2708 = vpow2.f32 %v594_v4  ;;  %vm412_vm0 = vmand %vm371_vm14, %vm380_vm7  ;;  %vm3641_vm7 = vcmp.ne.s32.totalorder %v2813_v12, %v2796_v7 }
 0x185   :  { %2710 = vpow2.f32 %v602_v41  ;;  %v1004_v59 = vpop.xlane.xlu1 %1003  ;;  %v1012_v40 = vpop.xlane.xlu2 %1011  ;;  %v428_v29 = vsel %vm412_vm0, %v3192_v37, -inf }
 0x186   :  { %v1024_v28 = vadd.f32 %v1004_v59, %v960_v17  ;;  %v1028_v50 = vadd.f32 %v1012_v40, %v964_v60  ;;  %v515_v3 = vpop.xlane.xlu0 %514 }
 0x187   :  { %v547_v58 = vmax.f32 %v531_v21, %v515_v3 }
 0x188   :  { %1040 = vst.msk [vmem:[#allocation5 + $0x58] sm:$0xff] %vm20_vm3, %v1024_v28  ;;  %v420_v28 = vsel %vm404_vm8, %v3176_v9, -inf  ;;  %vm418_vm8 = vmand %vm371_vm14, %vm386_vm1  ;;  %vm3645_vm1 = vcmp.ne.s32.totalorder %v2926_v43, %v2796_v7 }
 0x189   :  { %1044 = vst.msk [vmem:[#allocation5 + $0x78] sm:$0xff] %vm20_vm3, %v1028_v50  ;;  %v579_v35 = vsub.f32 %v531_v21, %v547_v58  ;;  %705 = vperm.xlu0 %2614, %v547_v58   ;;  %vm415_vm0 = vmand %vm371_vm14, %vm3645_vm1 }
 0x18a   :  { %v2709_v51 = vpop.eup %2708  ;;  %868 = vst.msk [vmem:[#allocation2 + $0x78] sm:$0xff] %vm20_vm3, %v547_v58 }
 0x18b   :  { %v2711_v47 = vpop.eup %2710  ;;  %v610_v30 = vmul.f32 1.442695, %v579_v35  ;;  %v3424_v36 = vsel %vm555_vm2, 0.0, %v2709_v51  ;;  %vm408_vm2 = vmand %vm371_vm14, %vm376_vm4 }
 0x18c   :  { %v3426_v4 = vsel %vm559_vm6, 0.0, %v2711_v47  ;;  %vm405_vm6 = vmand %vm371_vm14, %vm373_vm9  ;;  %v424_v60 = vsel %vm408_vm2, %v3178_v13, -inf  ;;  %vm3644_vm2 = vcmp.ne.s32.totalorder %v2816_v14, %v2796_v7 }
 0x18d   :  { %2712 = vpow2.f32 %v610_v30  ;;  %v421_v40 = vsel %vm405_vm6, %v3240_v27, -inf  ;;  %vm416_vm9 = vmand %vm371_vm14, %vm384_vm15 }
 0x18e   :  { %vm409_vm4 = vmand %vm371_vm14, %vm377_vm12  ;;  %v432_v27 = vsel %vm416_vm9, %v3208_v52, -inf }
 0x18f   :  { %vm413_vm12 = vmand %vm371_vm14, %vm381_vm11  ;;  %vm3643_vm11 = vcmp.ne.s32.totalorder %v2858_v26, %v2796_v7  ;;  %v434_v26 = vsel %vm418_vm8, %v3310_v63, -inf }
 0x190   :  { %vm406_vm15 = vmand %vm371_vm14, %vm3641_vm7 }
 0x191   :  { %vm407_vm6 = vmand %vm371_vm14, %vm3644_vm2 }
 0x192   :  { %vm417_vm9 = vmand %vm371_vm14, %vm385_vm10  ;;  %vm3646_vm10 = vcmp.ne.s32.totalorder %v2941_v49, %v2796_v7 }
 0x193   :  { %v2713_v41 = vpop.eup %2712  ;;  %v433_v43 = vsel %vm417_vm9, %v3232_v32, -inf }
 0x194   :  { %v3428_v17 = vsel %vm563_vm13, 0.0, %v2713_v41  ;;  %v425_v41 = vsel %vm409_vm4, %v3210_v55, -inf  ;;  %v429_v55 = vsel %vm413_vm12, %v3278_v0, -inf  ;;  %vm410_vm13 = vmand %vm371_vm14, %vm3643_vm11 }
 0x195   :  { %v426_v12 = vsel %vm410_vm13, %v3293_v22, -inf  ;;  %vm419_vm4 = vmand %vm371_vm14, %vm387_vm5  ;;  %vm3647_vm5 = vcmp.ne.s32.totalorder %v2906_v39, %v2796_v7  ;;  %v756_v7 = vld [vmem:[#allocation3] sm:$0xff] }
 0x196   :  { %v435_v1 = vsel %vm419_vm4, %v3357_v2, -inf  ;;  %vm414_vm12 = vmand %vm371_vm14, %vm3646_vm10 }
 0x197   :  { %v430_v32 = vsel %vm414_vm12, %v3295_v33, -inf  ;;  %vm411_vm7 = vmand %vm371_vm14, %vm3647_vm5 }
 0x1aa   :  { %v631_v58 = vpop.permute.xlu1 %630 }
 0x1ab   :  { %v708_v57 = vsub.f32 %v420_v28, %v631_v58  ;;  %v636_v6 = vpop.permute.xlu2 %635 }
 0x1ac   :  { %v709_v3 = vsub.f32 %v421_v40, %v636_v6 }
 0x1ad   :  { %v724_v11 = vmul.f32 1.442695, %v708_v57 }
 0x1ae   :  { %v726_v16 = vmul.f32 1.442695, %v709_v3 }
 0x1af   :  { %2714 = vpow2.f32 %v724_v11 }
 0x1b2   :  { %v651_v9 = vpop.permute.xlu1 %650 }
 0x1b3   :  { %v712_v21 = vsub.f32 %v424_v60, %v651_v9  ;;  %v656_v51 = vpop.permute.xlu2 %655 }
 0x1b4   :  { %v713_v37 = vsub.f32 %v425_v41, %v656_v51 }
 0x1b5   :  { %v2715_v59 = vpop.eup %2714  ;;  %v732_v50 = vmul.f32 1.442695, %v712_v21 }
 0x1b6   :  { %788 = vadd.xlane.f32.xlu2 %v2715_v59  ;;  %v734_v24 = vmul.f32 1.442695, %v713_v37  ;;  %v422_v59 = vsel %vm406_vm15, %v3256_v48, -inf }
 0x1b7   :  { %2716 = vpow2.f32 %v732_v50 }
 0x1b8   :  { %2718 = vpow2.f32 %v726_v16  ;;  %v3642_v16 = vmov 0.0  }
 0x1ba   :  { %v671_v13 = vpop.permute.xlu1 %670 }
 0x1bb   :  { %v716_v31 = vsub.f32 %v428_v29, %v671_v13  ;;  %v691_v35 = vpop.permute.xlu0 %690  ;;  %v696_v21 = vpop.permute.xlu2 %695 }
 0x1bc   :  { %v720_v47 = vsub.f32 %v432_v27, %v691_v35 }
 0x1bd   :  { %v2717_v45 = vpop.eup %2716  ;;  %v740_v30 = vmul.f32 1.442695, %v716_v31 }
 0x1be   :  { %v748_v28 = vmul.f32 1.442695, %v720_v47  ;;  %796 = vadd.xlane.f32.xlu1 %v2717_v45  ;;  %v2719_v58 = vpop.eup %2718  ;;  %v423_v45 = vsel %vm407_vm6, %v3328_v10, -inf  ;;  %v431_v10 = vsel %vm415_vm0, %v3345_v18, -inf }
 0x1bf   :  { %2720 = vpow2.f32 %v740_v30 }
 0x1c0   :  { %2722 = vpow2.f32 %v748_v28  ;;  %v721_v28 = vsub.f32 %v433_v43, %v696_v21 }
 0x1c1   :  { %2724 = vpow2.f32 %v734_v24 }
 0x1c3   :  { %v681_v13 = vpop.permute.xlu2 %680 }
 0x1c4   :  { %v718_v18 = vsub.f32 %v430_v32, %v681_v13 }
 0x1c5   :  { %v2721_v57 = vpop.eup %2720 }
 0x1c6   :  { %804 = vadd.xlane.f32.xlu2 %v2721_v57  ;;  %790 = vadd.xlane.f32.xlu1 %v2719_v58  ;;  %v2723_v11 = vpop.eup %2722 }
 0x1c7   :  { %812 = vadd.xlane.f32.xlu0 %v2723_v11  ;;  %v2725_v52 = vpop.eup %2724  ;;  %v750_v11 = vmul.f32 1.442695, %v721_v28 }
 0x1ce   :  { %798 = vadd.xlane.f32.xlu2 %v2725_v52 }
 0x1d2   :  { %v646_v35 = vpop.permute.xlu2 %645 }
 0x1d3   :  { %v676_v6 = vpop.permute.xlu0 %675  ;;  %v711_v54 = vsub.f32 %v423_v45, %v646_v35  ;;  %v757_v35 = vld [vmem:[#allocation3 + $0x8] sm:$0xff] }
 0x1d4   :  { %v717_v60 = vsub.f32 %v429_v55, %v676_v6  ;;  %v744_v55 = vmul.f32 1.442695, %v718_v18  ;;  %v773_v45 = vmul.f32 %v757_v35, %v3390_v8  ;;  %v1842_v18 = vmul.f32 14.285714, %v3190_v25 }
 0x1d5   :  { %v730_v63 = vmul.f32 1.442695, %v711_v54 }
 0x1d6   :  { %v742_v9 = vmul.f32 1.442695, %v717_v60  ;;  %v427_v60 = vsel %vm411_vm7, %v3347_v61, -inf  ;;  %v760_v61 = vld [vmem:[#allocation3 + $0x20] sm:$0xff] }
 0x1d7   :  { %v776_v13 = vmul.f32 %v760_v61, %v3371_v46  ;;  %v1645_v61 = vld [vmem:[#allocation2 + $0x8] sm:$0xff] }
 0x1d8   :  { %2726 = vpow2.f32 %v742_v9 }
 0x1da   :  { %v666_v49 = vpop.permute.xlu2 %665 }
 0x1db   :  { %v641_v40 = vpop.permute.xlu0 %640  ;;  %v715_v33 = vsub.f32 %v427_v60, %v666_v49  ;;  %v1954_v49 = vld [vmem:[#allocation5] sm:$0xff] }
 0x1dc   :  { %v710_v34 = vsub.f32 %v422_v59, %v641_v40  ;;  %v1906_v40 = vld [vmem:[#allocation4] sm:$0xff] }
 0x1dd   :  { %v738_v9 = vmul.f32 1.442695, %v715_v33  ;;  %vm1922_vm15 = vcmp.lt.f32.partialorder %v1906_v40, 1e-06 }
 0x1de   :  { %v2727_v50 = vpop.eup %2726  ;;  %v728_v3 = vmul.f32 1.442695, %v710_v34  ;;  %v1938_v39 = vsel %vm1922_vm15, 1.0, %v1906_v40  ;;  %v772_v34 = vmul.f32 %v756_v7, %v3373_v20 }
 0x1df   :  { %806 = vadd.xlane.f32.xlu0 %v2727_v50  ;;  %2662 = vperm.xlu1 %2608, %v3642_v16   ;;  %vm2007_vm11 = vweird.f32 %v1938_v39 }
 0x1e0   :  { %2728 = vpow2.f32 %v728_v3 }
 0x1e3   :  { %v661_v0 = vpop.permute.xlu1 %660 }
 0x1e4   :  { %v714_v29 = vsub.f32 %v426_v12, %v661_v0 }
 0x1e6   :  { %v2729_v48 = vpop.eup %2728  ;;  %v736_v31 = vmul.f32 1.442695, %v714_v29  ;;  %v3529_v29 = vld [vmem:[#allocation4 + $0x8] sm:$0xff] }
 0x1e7   :  { %792 = vadd.xlane.f32.xlu0 %v2729_v48  ;;  %vm1923_vm14 = vcmp.lt.f32.partialorder %v3529_v29, 1e-06 }
 0x1e8   :  { %2730 = vpow2.f32 %v736_v31  ;;  %v3536_v20 = vsel %vm1923_vm14, 1.0, %v3529_v29 }
 0x1e9   :  { %vm2022_vm6 = vweird.f32 %v3536_v20 }
 0x1eb   :  { %v701_v27 = vpop.permute.xlu1 %700 }
 0x1ec   :  { %v722_v22 = vsub.f32 %v434_v26, %v701_v27 }
 0x1ee   :  { %v2731_v51 = vpop.eup %2730  ;;  %v752_v47 = vmul.f32 1.442695, %v722_v22  ;;  %v764_v22 = vld [vmem:[#allocation3 + $0x40] sm:$0xff] }
 0x1ef   :  { %800 = vadd.xlane.f32.xlu0 %v2731_v51  ;;  %v780_v46 = vmul.f32 %v764_v22, %v3381_v23  ;;  %v2011_v23 = vand.u32 2147483647, %v1938_v39 }
 0x1f0   :  { %2732 = vpow2.f32 %v752_v47  ;;  %v768_v47 = vld [vmem:[#allocation3 + $0x60] sm:$0xff] }
 0x1f1   :  { %2734 = vpow2.f32 %v730_v63  ;;  %v784_v43 = vmul.f32 %v768_v47, %v3383_v15  ;;  %vm2012_vm2 = vcmp.eq.f32.partialorder %v2011_v23, 8.507059e+37  ;;  %v1955_v47 = vld [vmem:[#allocation5 + $0x8] sm:$0xff]  ;;  %v770_v23 = vld [vmem:[#allocation3 + $0x70] sm:$0xff] }
 0x1f3   :  { %v686_v14 = vpop.permute.xlu1 %685 }
 0x1f4   :  { %v719_v41 = vsub.f32 %v431_v10, %v686_v14  ;;  %v2013_v14 = vand.u32 2147483648, %v1938_v39 }
 0x1f6   :  { %v2733_v30 = vpop.eup %2732  ;;  %v746_v37 = vmul.f32 1.442695, %v719_v41  ;;  %v2014_v32 = vor.u32 1.1754944e-38, %v2013_v14 }
 0x1f7   :  { %816 = vadd.xlane.f32.xlu2 %v2733_v30  ;;  %v2735_v57 = vpop.eup %2734 }
 0x1f8   :  { %2736 = vpow2.f32 %v746_v37 }
 0x1fb   :  { %v706_v24 = vpop.permute.xlu0 %705 }
 0x1fc   :  { %v723_v58 = vsub.f32 %v435_v1, %v706_v24 }
 0x1fe   :  { %v754_v56 = vmul.f32 1.442695, %v723_v58  ;;  %v2737_v52 = vpop.eup %2736  ;;  %v1644_v58 = vld [vmem:[#allocation2] sm:$0xff] }
 0x1ff   :  { %794 = vadd.xlane.f32.xlu2 %v2735_v57 }
 0x200   :  { %2738 = vpow2.f32 %v754_v56 }
 0x201   :  { %2740 = vpow2.f32 %v750_v11  ;;  %v761_v11 = vld [vmem:[#allocation3 + $0x28] sm:$0xff] }
 0x202   :  { %2742 = vpow2.f32 %v744_v55  ;;  %v777_v55 = vmul.f32 %v761_v11, %v3397_v53 }
 0x203   :  { %2744 = vpow2.f32 %v738_v9 }
 0x204   :  { %2746 = vrcp.f32 %v1938_v39 }
 0x206   :  { %v2739_v2 = vpop.eup %2738 }
 0x207   :  { %810 = vadd.xlane.f32.xlu2 %v2737_v52  ;;  %818 = vadd.xlane.f32.xlu0 %v2739_v2  ;;  %v2741_v6 = vpop.eup %2740 }
 0x208   :  { %v2743_v21 = vpop.eup %2742 }
 0x209   :  { %814 = vadd.xlane.f32.xlu1 %v2741_v6  ;;  %v2745_v59 = vpop.eup %2744 }
 0x20a   :  { %v2747_v12 = vpop.eup %2746 }
 0x20b   :  { %v2003_v0 = vmul.f32 %v2747_v12, %v1938_v39  ;;  %vm2008_vm13 = vweird.f32 %v2747_v12 }
 0x20c   :  { %vm3542_vm8 = vmor %vm2007_vm11, %vm2008_vm13 }
 0x20d   :  { %v2004_v26 = vsub.f32 1.0, %v2003_v0 }
 0x20f   :  { %v2005_v51 = vmul.f32 %v2747_v12, %v2004_v26  ;;  %v1843_v26 = vmul.f32 14.285714, %v3202_v42 }
 0x211   :  { %808 = vadd.xlane.f32.xlu1 %v2743_v21  ;;  %v2006_v28 = vadd.f32 %v2747_v12, %v2005_v51 }
 0x213   :  { %v2010_v15 = vsel %vm3542_vm8, %v2747_v12, %v2006_v28  ;;  %v762_v28 = vld [vmem:[#allocation3 + $0x30] sm:$0xff] }
 0x219   :  { %802 = vadd.xlane.f32.xlu1 %v2745_v59  ;;  %v2015_v59 = vsel %vm2012_vm2, %v2014_v32, %v2010_v15  ;;  %v769_v32 = vld [vmem:[#allocation3 + $0x68] sm:$0xff] }
 0x229   :  { %v789_v50 = vpop.xlane.xlu2 %788 }
 0x22a   :  { %v820_v3 = vadd.f32 %v789_v50, %v772_v34  ;;  %v2028_v50 = vand.u32 2147483648, %v3536_v20 }
 0x22c   :  { %837 = vst.msk [vmem:[#allocation3] sm:$0xff] %vm20_vm3, %v820_v3 }
 0x231   :  { %v797_v48 = vpop.xlane.xlu1 %796 }
 0x232   :  { %v824_v31 = vadd.f32 %v797_v48, %v776_v13  ;;  %2677 = vperm.xlu1 %2608, %v3642_v16   ;;  %v765_v13 = vld [vmem:[#allocation3 + $0x48] sm:$0xff] }
 0x233   :  { %v1660_v27 = vld [vmem:[#allocation3] sm:$0xff]  ;;  %v781_v51 = vmul.f32 %v765_v13, %v3402_v62  ;;  %v758_v62 = vld [vmem:[#allocation3 + $0x10] sm:$0xff] }
 0x234   :  { %841 = vst.msk [vmem:[#allocation3 + $0x20] sm:$0xff] %vm20_vm3, %v824_v31  ;;  %2748 = vlog2.f32 %v1660_v27  ;;  %v2029_v31 = vor.u32 1.1754944e-38, %v2028_v50 }
 0x235   :  { %2750 = vrcp.f32 %v3536_v20 }
 0x239   :  { %v805_v54 = vpop.xlane.xlu2 %804  ;;  %v791_v63 = vpop.xlane.xlu1 %790 }
 0x23a   :  { %v2749_v30 = vpop.eup %2748  ;;  %v828_v10 = vadd.f32 %v805_v54, %v780_v46  ;;  %v821_v41 = vadd.f32 %v791_v63, %v773_v45  ;;  %v813_v37 = vpop.xlane.xlu0 %812 }
 0x23b   :  { %v1677_v1 = vmul.f32 0.6931472, %v2749_v30  ;;  %v832_v8 = vadd.f32 %v813_v37, %v784_v43  ;;  %v2751_v57 = vpop.eup %2750  ;;  %v778_v37 = vmul.f32 %v762_v28, %v3414_v5  ;;  %v771_v5 = vld [vmem:[#allocation3 + $0x78] sm:$0xff] }
 0x23c   :  { %845 = vst.msk [vmem:[#allocation3 + $0x40] sm:$0xff] %vm20_vm3, %v828_v10  ;;  %v2018_v6 = vmul.f32 %v2751_v57, %v3536_v20  ;;  %vm2023_vm1 = vweird.f32 %v2751_v57 }
 0x23d   :  { %838 = vst.msk [vmem:[#allocation3 + $0x8] sm:$0xff] %vm20_vm3, %v821_v41  ;;  %v1708_v56 = vadd.f32 %v1677_v1, %v1644_v58  ;;  %vm3558_vm0 = vmor %vm2022_vm6, %vm2023_vm1 }
 0x23e   :  { %849 = vst.msk [vmem:[#allocation3 + $0x60] sm:$0xff] %vm20_vm3, %v832_v8  ;;  %v2019_v34 = vsub.f32 1.0, %v2018_v6  ;;  %v786_v8 = vmul.f32 %v770_v23, %v3412_v44  ;;  %v3652_v6 = vld [vmem:[#allocation6_spill] sm:$0xff] }
 0x23f   :  { %v1858_v52 = vmul.f32 16.0, %v1708_v56  ;;  %v1970_v2 = vmul.f32 %v1906_v40, %v1708_v56  ;;  %v2026_v40 = vand.u32 2147483647, %v3536_v20 }
 0x240   :  { %v2020_v25 = vmul.f32 %v2751_v57, %v2019_v34 }
 0x241   :  { %v799_v60 = vpop.xlane.xlu2 %798  ;;  %v1874_v33 = vsub.f32 %v1842_v18, %v1858_v52  ;;  %v1986_v9 = vsub.f32 %v1954_v49, %v1970_v2  ;;  %vm2027_vm9 = vcmp.eq.f32.partialorder %v2026_v40, 8.507059e+37  ;;  %v787_v52 = vmul.f32 %v771_v5, %v3428_v17  ;;  %v763_v17 = vld [vmem:[#allocation3 + $0x38] sm:$0xff] }
 0x242   :  { %v825_v21 = vadd.f32 %v799_v60, %v777_v55  ;;  %v2021_v12 = vadd.f32 %v2751_v57, %v2020_v25  ;;  %v785_v60 = vmul.f32 %v769_v32, %v3652_v6 }
 0x243   :  { %2260 = vperm.xlu2 %2620, %v1874_v33   ;;  %v2016_v39 = vmul.f32 %v2015_v59, %v1986_v9  ;;  %v766_v9 = vld [vmem:[#allocation3 + $0x50] sm:$0xff] }
 0x244   :  { %842 = vst.msk [vmem:[#allocation3 + $0x28] sm:$0xff] %vm20_vm3, %v825_v21  ;;  %v1661_v7 = vld [vmem:[#allocation3 + $0x8] sm:$0xff]  ;;  %v2025_v35 = vsel %vm3558_vm0, %v2751_v57, %v2021_v12  ;;  %v759_v57 = vld [vmem:[#allocation3 + $0x18] sm:$0xff] }
 0x245   :  { %2356 = vperm.xlu0 %2614, %v2016_v39   ;;  %2752 = vlog2.f32 %v1661_v7  ;;  %v2030_v10 = vsel %vm2027_vm9, %v2029_v31, %v2025_v35  ;;  %v775_v11 = vmul.f32 %v759_v57, %v3419_v38  ;;  %v3653_v21 = vld [vmem:[#allocation7_spill] sm:$0xff]  ;;  %v779_v7 = vmul.f32 %v763_v17, %v3424_v36 }
 0x246   :  { %v782_v59 = vmul.f32 %v766_v9, %v3653_v21 }
 0x24b   :  { %v2753_v53 = vpop.eup %2752 }
 0x24c   :  { %v1679_v3 = vmul.f32 0.6931472, %v2753_v53 }
 0x24e   :  { %v1709_v48 = vadd.f32 %v1679_v3, %v1645_v61 }
 0x250   :  { %v1859_v27 = vmul.f32 16.0, %v1709_v48  ;;  %v1971_v22 = vmul.f32 %v3529_v29, %v1709_v48  ;;  %v774_v29 = vmul.f32 %v758_v62, %v3395_v19 }
 0x251   :  { %v2663_v20 = vpop.permute.xlu1 %2662 }
 0x252   :  { %v2665_v46 = vunpack.i.h.bf16 %v2663_v20  ;;  %v2664_v45 = vunpack.i.l.bf16 %v2663_v20  ;;  %v807_v54 = vpop.xlane.xlu0 %806  ;;  %v1875_v63 = vsub.f32 %v1843_v26, %v1859_v27  ;;  %v1987_v14 = vsub.f32 %v1955_v47, %v1971_v22 }
 0x253   :  { %v829_v30 = vadd.f32 %v807_v54, %v781_v51 }
 0x254   :  { %2443 = vst [vmem:[%s3628_s4 + $0x48] sm:$0xff] %v2665_v46  ;;  %2265 = vperm.xlu0 %2614, %v1875_v63   ;;  %v2031_v42 = vmul.f32 %v2030_v10, %v1987_v14 }
 0x255   :  { %2442 = vst [vmem:[%s3628_s4 + $0x40] sm:$0xff] %v2664_v45 }
 0x256   :  { %846 = vst.msk [vmem:[#allocation3 + $0x48] sm:$0xff] %vm20_vm3, %v829_v30  ;;  %2361 = vperm.xlu2 %2620, %v2031_v42  }
 0x25a   :  { %v793_v41 = vpop.xlane.xlu0 %792 }
 0x25b   :  { %v822_v43 = vadd.f32 %v793_v41, %v774_v29 }
 0x25c   :  { %2667 = vperm.xlu0 %2614, %v3642_v16  }
 0x25d   :  { %839 = vst.msk [vmem:[#allocation3 + $0x10] sm:$0xff] %vm20_vm3, %v822_v43 }
 0x25e   :  { %2672 = vperm.xlu2 %2620, %v3642_v16   ;;  %v767_v16 = vld [vmem:[#allocation3 + $0x58] sm:$0xff] }
 0x25f   :  { %v783_v18 = vmul.f32 %v767_v16, %v3426_v4 }
 0x262   :  { %v801_v1 = vpop.xlane.xlu0 %800 }
 0x263   :  { %v826_v24 = vadd.f32 %v801_v1, %v778_v37 }
 0x265   :  { %843 = vst.msk [vmem:[#allocation3 + $0x30] sm:$0xff] %vm20_vm3, %v826_v24 }
 0x26a   :  { %v817_v58 = vpop.xlane.xlu2 %816 }
 0x26b   :  { %v834_v19 = vadd.f32 %v817_v58, %v786_v8 }
 0x26d   :  { %851 = vst.msk [vmem:[#allocation3 + $0x70] sm:$0xff] %vm20_vm3, %v834_v19 }
 0x272   :  { %v795_v56 = vpop.xlane.xlu2 %794 }
 0x273   :  { %v823_v15 = vadd.f32 %v795_v56, %v775_v11 }
 0x275   :  { %840 = vst.msk [vmem:[#allocation3 + $0x18] sm:$0xff] %vm20_vm3, %v823_v15 }
 0x27a   :  { %v811_v2 = vpop.xlane.xlu2 %810  ;;  %v819_v44 = vpop.xlane.xlu0 %818 }
 0x27b   :  { %v831_v55 = vadd.f32 %v811_v2, %v783_v18  ;;  %v835_v49 = vadd.f32 %v819_v44, %v787_v52 }
 0x27c   :  { %v815_v33 = vpop.xlane.xlu1 %814 }
 0x27d   :  { %848 = vst.msk [vmem:[#allocation3 + $0x58] sm:$0xff] %vm20_vm3, %v831_v55  ;;  %v833_v38 = vadd.f32 %v815_v33, %v785_v60 }
 0x27e   :  { %852 = vst.msk [vmem:[#allocation3 + $0x78] sm:$0xff] %vm20_vm3, %v835_v49 }
 0x27f   :  { %850 = vst.msk [vmem:[#allocation3 + $0x68] sm:$0xff] %vm20_vm3, %v833_v38 }
 0x284   :  { %v809_v4 = vpop.xlane.xlu1 %808 }
 0x285   :  { %v830_v39 = vadd.f32 %v809_v4, %v782_v59 }
 0x287   :  { %847 = vst.msk [vmem:[#allocation3 + $0x50] sm:$0xff] %vm20_vm3, %v830_v39 }
 0x28c   :  { %v803_v34 = vpop.xlane.xlu1 %802 }
 0x28d   :  { %v827_v25 = vadd.f32 %v803_v34, %v779_v7 }
 0x28f   :  { %844 = vst.msk [vmem:[#allocation3 + $0x38] sm:$0xff] %vm20_vm3, %v827_v25 }
 0x29d   :  { %v2261_v53 = vpop.permute.xlu2 %2260 }
 0x29e   :  { %2338 = vst [vmem:[%s3627_s3] sm:$0xff] %v2261_v53 }
 0x2a4   :  { %v2678_v40 = vpop.permute.xlu1 %2677 }
 0x2a5   :  { %v2680_v50 = vunpack.i.h.bf16 %v2678_v40  ;;  %v2679_v3 = vunpack.i.l.bf16 %v2678_v40 }
 0x2a7   :  { %2449 = vst [vmem:[%s3628_s4 + $0x78] sm:$0xff] %v2680_v50 }
 0x2a8   :  { %2448 = vst [vmem:[%s3628_s4 + $0x70] sm:$0xff] %v2679_v3 }
 0x2b0   :  { %v2362_v36 = vpop.permute.xlu2 %2361 }
 0x2b1   :  { %2435 = vst [vmem:[%s3628_s4 + $0x8] sm:$0xff] %v2362_v36 }
 0x2b7   :  { %v2357_v12 = vpop.permute.xlu0 %2356 }
 0x2b8   :  { %v2673_v61 = vpop.permute.xlu2 %2672  ;;  %2434 = vst [vmem:[%s3628_s4] sm:$0xff] %v2357_v12 }
 0x2b9   :  { %v2675_v0 = vunpack.i.h.bf16 %v2673_v61  ;;  %v2674_v13 = vunpack.i.l.bf16 %v2673_v61 }
 0x2bb   :  { %2447 = vst [vmem:[%s3628_s4 + $0x68] sm:$0xff] %v2675_v0 }
 0x2bc   :  { %2446 = vst [vmem:[%s3628_s4 + $0x60] sm:$0xff] %v2674_v13 }
 0x2c6   :  { %v2266_v48 = vpop.permute.xlu0 %2265 }
 0x2c7   :  { %2339 = vst [vmem:[%s3627_s3 + $0x8] sm:$0xff] %v2266_v48 }
 0x2ce   :  { %v2668_v31 = vpop.permute.xlu0 %2667 }
 0x2cf   :  { %v2670_v26 = vunpack.i.h.bf16 %v2668_v31  ;;  %v2669_v27 = vunpack.i.l.bf16 %v2668_v31 }
 0x2d1   :  { %2445 = vst [vmem:[%s3628_s4 + $0x58] sm:$0xff] %v2670_v26 }
 0x2d2   :  { %2444 = vst [vmem:[%s3628_s4 + $0x50] sm:$0xff] %v2669_v27 }

</bundles_post_ra>
